<compile_context>
chip_gen: v7x
topology: tpu7x:2x2x1
jax: 0.10.0
libtpu: 0.0.40
codegen_flags: <defaults>
</compile_context>

<pallas_src>
import math
from dataclasses import dataclass
from functools import partial

import jax
import jax.numpy as jnp
from jax import lax
from jax.experimental import pallas as pl
from jax.experimental.pallas import tpu as pltpu


# ------------------------------- config -------------------------------------
@dataclass(frozen=True)
class GPTConfig:
    block_size: int = 16
    vocab_size: int = 128
    n_layer: int = 2
    n_head: int = 4
    n_embd: int = 32


def _vmem_limit_bytes():
    """Generation-aware scoped-VMEM budget (perf feedback):
    v5e/v6e (128 MiB physical) -> ~100 MiB, v7x (64 MiB) -> ~52 MiB,
    unknown generations -> conservative 32 MiB."""
    try:
        kind = jax.devices()[0].device_kind.lower()
    except Exception:
        return 32 * 1024 * 1024
    if "v7" in kind:
        return 52 * 1024 * 1024
    if ("v5 lite" in kind) or ("v5e" in kind) or ("v6" in kind):
        return 100 * 1024 * 1024
    return 32 * 1024 * 1024


# ----------------------------- kernel helpers --------------------------------
def _layernorm(x, w, b, eps=1e-5):
    # matches torch.nn.LayerNorm (biased variance, eps inside rsqrt), f32 math
    mu = jnp.mean(x, axis=-1, keepdims=True)
    xc = x - mu
    var = jnp.mean(xc * xc, axis=-1, keepdims=True)
    return xc * lax.rsqrt(var + eps) * w + b


def _gelu_tanh(x):
    # matches nn.GELU(approximate='tanh')
    c = math.sqrt(2.0 / math.pi)
    return 0.5 * x * (1.0 + jnp.tanh(c * (x + 0.044715 * x * x * x)))


def _causal_attention(q, k, v, q_tile):
    """q, k, v: (G, T, hd) bf16 with G = batch_block * n_head.
    Returns (G, T, hd) f32.

    Query-tiled (flash-style): the (tq, T) score tile replaces the full (T, T)
    score tensor so attention intermediates scale linearly with T in VMEM; the
    whole key axis stays resident, so the per-row softmax is exact.
    1/sqrt(head_dim) is pre-folded into the Q projection weights.
    """
    G, T, hd = q.shape
    outs = []
    for qi in range(T // q_tile):
        q0 = qi * q_tile
        qt = q[:, q0:q0 + q_tile, :]                              # (G, tq, hd)
        s = jnp.einsum('gqd,gkd->gqk', qt, k,
                       preferred_element_type=jnp.float32)        # (G, tq, T)
        row = lax.broadcasted_iota(jnp.int32, (q_tile, T), 0) + q0
        col = lax.broadcasted_iota(jnp.int32, (q_tile, T), 1)
        s = jnp.where((row >= col)[None, :, :], s, -1e30)
        s = s - jnp.max(s, axis=-1, keepdims=True)
        p = jnp.exp(s)
        p = p * pl.reciprocal(jnp.sum(p, axis=-1, keepdims=True), approx=True)
        outs.append(jnp.einsum('gqk,gkd->gqd', p.astype(v.dtype), v,
                               preferred_element_type=jnp.float32))
    return outs[0] if len(outs) == 1 else jnp.concatenate(outs, axis=1)


# ----------------------------- Pallas kernels --------------------------------
def stack_kernel(x_ref, ln1w_ref, ln1b_ref, wqkv_ref, bqkv_ref, wpr_ref,
                 bpr_ref, ln2w_ref, ln2b_ref, wfc_ref, bfc_ref, wpr2_ref,
                 bpr2_ref, o_ref, *, n_head, q_tile):
    """All transformer Blocks for one batch block.  grid = (num_batch_blocks, n_layer).

    The residual stream is carried across the layer axis inside o_ref (output
    block index constant in l -> resident accumulator), so each layer costs
    zero activation HBM traffic; weights stream over the layer axis and are
    fetched once per batch block (not once per batch row).
    """
    l = pl.program_id(1)

    @pl.when(l == 0)
    def _():
        o_ref[...] = x_ref[...]                    # seed the residual carry
    # NOTE: x_ref is only consumed at l == 0 but its double-buffered block stays
    # resident for the whole pipeline -- accounted for in the VMEM budget.

    Bb, T, C = o_ref.shape
    R = Bb * T
    H = n_head
    hd = C // H
    bf16 = jnp.bfloat16

    x = o_ref[...].reshape(R, C)                   # (R, C) f32 residual carry

    ln1w = ln1w_ref[0]; ln1b = ln1b_ref[0]
    wqkv = wqkv_ref[0]; bqkv = bqkv_ref[0]
    wpr = wpr_ref[0];   bpr = bpr_ref[0]
    ln2w = ln2w_ref[0]; ln2b = ln2b_ref[0]
    wfc = wfc_ref[0];   bfc = bfc_ref[0]
    wpr2 = wpr2_ref[0]; bpr2 = bpr2_ref[0]

    # ---- causal self-attention (1/sqrt(hd) pre-folded into Q weights) ----
    h = _layernorm(x, ln1w, ln1b)
    qkv = jnp.dot(h.astype(bf16), wqkv,
                  preferred_element_type=jnp.float32) + bqkv      # (R, 3C) f32
    qkv = qkv.reshape(Bb, T, 3 * C)
    # TODO(synk): with small head_dim the hd-minor attention operands are
    # lane-sparse; packing head pairs to a 128-wide minor dim would cut XLU
    # transpose work and improve MXU feed.
    q = jnp.swapaxes(qkv[:, :, 0 * C:1 * C].astype(bf16).reshape(Bb, T, H, hd),
                     1, 2).reshape(Bb * H, T, hd)
    k = jnp.swapaxes(qkv[:, :, 1 * C:2 * C].astype(bf16).reshape(Bb, T, H, hd),
                     1, 2).reshape(Bb * H, T, hd)
    v = jnp.swapaxes(qkv[:, :, 2 * C:3 * C].astype(bf16).reshape(Bb, T, H, hd),
                     1, 2).reshape(Bb * H, T, hd)

    y = _causal_attention(q, k, v, q_tile)                        # (Bb*H,T,hd) f32
    y = jnp.swapaxes(y.reshape(Bb, H, T, hd), 1, 2).reshape(R, C)
    y = jnp.dot(y.astype(bf16), wpr, preferred_element_type=jnp.float32) + bpr
    x = x + y

    # ---- MLP ----
    h = _layernorm(x, ln2w, ln2b)
    h = jnp.dot(h.astype(bf16), wfc, preferred_element_type=jnp.float32) + bfc
    h = _gelu_tanh(h)
    h = jnp.dot(h.astype(bf16), wpr2, preferred_element_type=jnp.float32) + bpr2
    o_ref[...] = (x + h).reshape(Bb, T, C)


def head_kernel(x_ref, lnw_ref, lnb_ref, wte_t_ref, o_ref, xn_ref):
    """Final ln_f + tied lm_head.  grid = (row tiles, vocab tiles).

    ln_f and the f32->bf16 cast run once per row tile (at the first vocab
    tile) into a VMEM scratch and are reused for every vocab tile, so the
    inner vocab loop is purely MXU/DMA bound.
    """
    @pl.when(pl.program_id(1) == 0)
    def _():
        xn_ref[...] = _layernorm(x_ref[...], lnw_ref[...],
                                 lnb_ref[...]).astype(jnp.bfloat16)
    o_ref[...] = jnp.dot(xn_ref[...], wte_t_ref[...],
                         preferred_element_type=jnp.float32).astype(o_ref.dtype)


# ------------------------------ wrappers --------------------------------------
def run_blocks(x, layer_params, cfg, *, target_rows=256):
    B, T, C = x.shape
    L = cfg.n_layer

    # Batch-block size: pack enough sequences per block that bblk*T >= ~256 rows
    # (MXU occupancy) and weights are streamed once per batch block.
    bblk = max(1, min(B, max(1, target_rows // T)))
    while B % bblk != 0:
        bblk -= 1
    nb = B // bblk

    # query tile for the flash-style attention tiling inside the block body
    q_tile = T if (T <= 256 or T % 256 != 0) else 256

    act_spec = pl.BlockSpec((bblk, T, C), lambda b, l: (b, 0, 0))

    def w_spec(arr):   # per-layer weight slab streamed over the layer grid axis
        # TODO(synk): on v6e consider pipeline_mode=pl.Buffered(3) here to hide
        # per-layer weight DMA when per-layer compute is short.
        return pl.BlockSpec((1,) + arr.shape[1:], lambda b, l: (l, 0, 0))

    return pl.pallas_call(
        partial(stack_kernel, n_head=cfg.n_head, q_tile=q_tile),
        out_shape=jax.ShapeDtypeStruct(x.shape, x.dtype),
        grid=(nb, L),
        in_specs=[act_spec] + [w_spec(a) for a in layer_params],
        out_specs=act_spec,
        input_output_aliases={0: 0},     # residual stream updated in place
        compiler_params=pltpu.CompilerParams(
            dimension_semantics=("parallel", "arbitrary"),
            vmem_limit_bytes=_vmem_limit_bytes()),
    )(x, *layer_params)


def _row_tile(rows):
    # row (M) tile for the head: 256-512 at real sizes, full rows when tiny
    for tm in (512, 256, 128, 64, 32, 16, 8):
        if rows % tm == 0:
            return tm
    return rows


def _vocab_tile(Vp):
    # lane-dense vocab tile (multiple of 128); Vp is pre-padded to a multiple
    for tn in (2048, 1024, 512, 256, 128):
        if Vp % tn == 0:
            return tn
    return Vp


def run_head(x, lnf_w, lnf_b, wte_t, out_dtype=jnp.float32):
    B, T, C = x.shape
    Vp = wte_t.shape[1]
    rows = B * T
    tm = _row_tile(rows)
    tn = _vocab_tile(Vp)
    x2 = x.reshape(rows, C)              # lane-dense 2-D activation slab
    logits = pl.pallas_call(
        head_kernel,
        out_shape=jax.ShapeDtypeStruct((rows, Vp), out_dtype),
        grid=(rows // tm, Vp // tn),
        in_specs=[pl.BlockSpec((tm, C), lambda i, j: (i, 0)),   # row tile resident over vocab axis
                  pl.BlockSpec((1, C), lambda i, j: (0, 0)),
                  pl.BlockSpec((1, C), lambda i, j: (0, 0)),
                  pl.BlockSpec((C, tn), lambda i, j: (0, j))],  # vocab tiles streamed
        out_specs=pl.BlockSpec((tm, tn), lambda i, j: (i, j)),
        scratch_shapes=[pltpu.VMEM((tm, C), jnp.bfloat16)],     # hoisted ln_f(x) in bf16
        compiler_params=pltpu.CompilerParams(
            dimension_semantics=("parallel", "arbitrary"),
            vmem_limit_bytes=_vmem_limit_bytes()),
    )(x2, lnf_w, lnf_b, wte_t)
    return logits.reshape(B, T, Vp)
    # TODO(synk): for training, fuse softmax/cross-entropy (targets path) into
    # head_kernel (or emit bf16 logits) to avoid the full f32 logits writeback.


@partial(jax.jit, static_argnums=(2,))
def gpt_forward(idx, params, cfg):
    """idx: int32 (B, T) token ids -> logits (B, T, vocab_size)."""
    B, T = idx.shape
    assert T <= cfg.block_size
    tok_emb = params['wte'][idx]                    # (B, T, C) gather (plain JAX glue)
    pos_emb = params['wpe'][:T]                     # (T, C)
    x = (tok_emb + pos_emb[None, :, :]).astype(jnp.float32)
    x = run_blocks(x, params['layer'], cfg)
    logits = run_head(x, params['lnf_w'], params['lnf_b'], params['wte_t'])
    if logits.shape[-1] != cfg.vocab_size:          # drop padded vocab columns
        logits = logits[:, :, :cfg.vocab_size]
    return logits


# ------------------------------ param init ------------------------------------
def init_params(key, cfg):
    """Reference-layout fp32 parameters (Linear weights stored (in, out))."""
    std = 0.02
    C, V = cfg.n_embd, cfg.vocab_size

    def nrm(k, shape):
        return (std * jax.random.normal(k, shape)).astype(jnp.float32)

    keys = iter(jax.random.split(key, 2 + cfg.n_layer * 4))
    params = {
        'wte': nrm(next(keys), (V, C)),
        'wpe': nrm(next(keys), (cfg.block_size, C)),
        'lnf_w': jnp.ones((1, C), jnp.float32),
        'lnf_b': jnp.zeros((1, C), jnp.float32),
        'blocks': [],
    }
    for _ in range(cfg.n_layer):
        params['blocks'].append((
            jnp.ones((1, C), jnp.float32),        # ln1 weight
            jnp.zeros((1, C), jnp.float32),       # ln1 bias
            nrm(next(keys), (C, 3 * C)),          # c_attn weight (in, out)
            jnp.zeros((1, 3 * C), jnp.float32),   # c_attn bias
            nrm(next(keys), (C, C)),              # attn c_proj weight
            jnp.zeros((1, C), jnp.float32),       # attn c_proj bias
            jnp.ones((1, C), jnp.float32),        # ln2 weight
            jnp.zeros((1, C), jnp.float32),       # ln2 bias
            nrm(next(keys), (C, 4 * C)),          # mlp c_fc weight
            jnp.zeros((1, 4 * C), jnp.float32),   # mlp c_fc bias
            nrm(next(keys), (4 * C, C)),          # mlp c_proj weight
            jnp.zeros((1, C), jnp.float32),       # mlp c_proj bias
        ))
    return params


def _pad_vocab(V):
    unit = 2048 if V >= 2048 else 128
    return ((V + unit - 1) // unit) * unit


def prepare_params(params, cfg):
    """One-time conversion to kernel-friendly params: per-layer weights stacked
    along a leading layer axis, matmul weights cast to bf16 (f32 accumulation
    stays in-kernel), attention 1/sqrt(hd) folded into the Q columns of c_attn,
    tied lm_head weight materialized once as a lane-dense (C, V_padded) bf16
    slab (vocab padded to a multiple of 2048/128 for unmasked, streamed tiles)."""
    C = cfg.n_embd
    scale = 1.0 / math.sqrt(C // cfg.n_head)
    bf16 = jnp.bfloat16

    def stack(i):
        return jnp.stack([blk[i] for blk in params['blocks']], axis=0)

    ln1w, ln1b = stack(0), stack(1)
    wqkv, bqkv = stack(2), stack(3)
    wpr, bpr = stack(4), stack(5)
    ln2w, ln2b = stack(6), stack(7)
    wfc, bfc = stack(8), stack(9)
    wpr2, bpr2 = stack(10), stack(11)

    # fold the attention scale into q = x @ Wq + bq (exact rescaling)
    wqkv = wqkv.at[:, :, :C].multiply(scale)
    bqkv = bqkv.at[:, :, :C].multiply(scale)

    Vp = _pad_vocab(cfg.vocab_size)
    wte_t = params['wte'].T.astype(bf16)          # (C, V) bf16, tied lm_head
    if Vp != cfg.vocab_size:
        wte_t = jnp.pad(wte_t, ((0, 0), (0, Vp - cfg.vocab_size)))

    return {
        'wte': params['wte'],                     # (V, C) f32 for embedding gather
        'wpe': params['wpe'],
        'lnf_w': params['lnf_w'],
        'lnf_b': params['lnf_b'],
        'wte_t': wte_t,                           # (C, Vp) bf16, lane-dense
        'layer': (ln1w, ln1b, wqkv.astype(bf16), bqkv, wpr.astype(bf16), bpr,
                  ln2w, ln2b, wfc.astype(bf16), bfc, wpr2.astype(bf16), bpr2),
    }


# --------------------------------- main ---------------------------------------
if __name__ == "__main__":
    cfg = GPTConfig(block_size=16, vocab_size=128, n_layer=2, n_head=4,
                    n_embd=32)
    key = jax.random.PRNGKey(0)
    k_params, k_idx = jax.random.split(key)
    params = prepare_params(init_params(k_params, cfg), cfg)

    B, T = 2, 8
    idx = jax.random.randint(k_idx, (B, T), 0, cfg.vocab_size, dtype=jnp.int32)

    logits = gpt_forward(idx, params, cfg)
    logits = jax.block_until_ready(logits)

    assert logits.shape == (B, T, cfg.vocab_size)
    assert logits.dtype == jnp.float32
    assert bool(jnp.all(jnp.isfinite(logits)))
    # TODO(synk): targets/cross-entropy loss path, configure_optimizers, DDP and
    # from_pretrained are training/infra code, not part of the forward kernel.
    print("KERNEL_OK")
</pallas_src>

<mosaic_0001>
module attributes {stable_mosaic.version = 11 : i64} {
  func.func @head_kernel(%arg0: i32, %arg1: i32, %arg2: memref<16x32xf32, #tpu.memory_space<vmem>>, %arg3: memref<1x32xf32, #tpu.memory_space<vmem>>, %arg4: memref<1x32xf32, #tpu.memory_space<vmem>>, %arg5: memref<32x128xbf16, #tpu.memory_space<vmem>>, %arg6: memref<16x128xf32, #tpu.memory_space<vmem>>, %arg7: memref<16x32xbf16, #tpu.memory_space<vmem>>) attributes {dimension_semantics = [#tpu.dimension_semantics<parallel>, #tpu.dimension_semantics<arbitrary>], iteration_bounds = array<i64: 1, 1>, scalar_prefetch = 0 : i64, scratch_operands = 1 : i64, tpu.core_type = #tpu.core_type<tc>, window_params = [{transform_indices = @transform_0, window_bounds = array<i64: 16, 32>}, {pipeline_mode = #tpu.pipeline_mode<synchronous>, transform_indices = @transform_1, window_bounds = array<i64: 1, 32>}, {pipeline_mode = #tpu.pipeline_mode<synchronous>, transform_indices = @transform_2, window_bounds = array<i64: 1, 32>}, {transform_indices = @transform_3, window_bounds = array<i64: 32, 128>}, {transform_indices = @transform_4, window_bounds = array<i64: 16, 128>}]} {
    %c0_i32 = arith.constant 0 : i32
    %0 = arith.cmpi eq, %arg1, %c0_i32 : i32
    %1 = arith.extui %0 : i1 to i32
    %c0_i32_0 = arith.constant 0 : i32
    %2 = arith.cmpi ne, %1, %c0_i32_0 : i32
    scf.if %2 {
      %c0_6 = arith.constant 0 : index
      %c0_7 = arith.constant 0 : index
      %7 = vector.load %arg2[%c0_6, %c0_7] : memref<16x32xf32, #tpu.memory_space<vmem>>, vector<16x32xf32>
      %c0_8 = arith.constant 0 : index
      %c0_9 = arith.constant 0 : index
      %8 = vector.load %arg3[%c0_8, %c0_9] : memref<1x32xf32, #tpu.memory_space<vmem>>, vector<1x32xf32>
      %c0_10 = arith.constant 0 : index
      %c0_11 = arith.constant 0 : index
      %9 = vector.load %arg4[%c0_10, %c0_11] : memref<1x32xf32, #tpu.memory_space<vmem>>, vector<1x32xf32>
      %cst_12 = arith.constant dense<0.000000e+00> : vector<16xf32>
      %10 = vector.multi_reduction <add>, %7, %cst_12 [1] : vector<16x32xf32> to vector<16xf32>
      %11 = vector.shape_cast %10 : vector<16xf32> to vector<16x1xf32>
      %cst_13 = arith.constant 3.200000e+01 : f32
      %12 = vector.broadcast %cst_13 : f32 to vector<16x1xf32>
      %13 = arith.divf %11, %12 : vector<16x1xf32>
      %14 = vector.broadcast %13 : vector<16x1xf32> to vector<16x32xf32>
      %15 = arith.subf %7, %14 : vector<16x32xf32>
      %16 = arith.mulf %15, %15 : vector<16x32xf32>
      %cst_14 = arith.constant dense<0.000000e+00> : vector<16xf32>
      %17 = vector.multi_reduction <add>, %16, %cst_14 [1] : vector<16x32xf32> to vector<16xf32>
      %18 = vector.shape_cast %17 : vector<16xf32> to vector<16x1xf32>
      %cst_15 = arith.constant 3.200000e+01 : f32
      %19 = vector.broadcast %cst_15 : f32 to vector<16x1xf32>
      %20 = arith.divf %18, %19 : vector<16x1xf32>
      %cst_16 = arith.constant 9.99999974E-6 : f32
      %21 = vector.broadcast %cst_16 : f32 to vector<16x1xf32>
      %22 = arith.addf %20, %21 : vector<16x1xf32>
      %23 = math.rsqrt %22 : vector<16x1xf32>
      %24 = vector.broadcast %23 : vector<16x1xf32> to vector<16x32xf32>
      %25 = arith.mulf %15, %24 : vector<16x32xf32>
      %26 = vector.broadcast %8 : vector<1x32xf32> to vector<16x32xf32>
      %27 = arith.mulf %25, %26 : vector<16x32xf32>
      %28 = vector.broadcast %9 : vector<1x32xf32> to vector<16x32xf32>
      %29 = arith.addf %27, %28 : vector<16x32xf32>
      %30 = arith.truncf %29 : vector<16x32xf32> to vector<16x32xbf16>
      %c0_17 = arith.constant 0 : index
      %c0_18 = arith.constant 0 : index
      %31 = vector.load %arg7[%c0_17, %c0_18] : memref<16x32xbf16, #tpu.memory_space<vmem>>, vector<16x32xbf16>
      tpu.vector_store %arg7[%c0_17, %c0_18], %30 {strides = array<i32>} : memref<16x32xbf16, #tpu.memory_space<vmem>>, vector<16x32xbf16>,
    } else {
    }
    %c0 = arith.constant 0 : index
    %c0_1 = arith.constant 0 : index
    %3 = vector.load %arg7[%c0, %c0_1] : memref<16x32xbf16, #tpu.memory_space<vmem>>, vector<16x32xbf16>
    %c0_2 = arith.constant 0 : index
    %c0_3 = arith.constant 0 : index
    %4 = vector.load %arg5[%c0_2, %c0_3] : memref<32x128xbf16, #tpu.memory_space<vmem>>, vector<32x128xbf16>
    %cst = arith.constant dense<0.000000e+00> : vector<16x128xf32>
    %5 = tpu.matmul %3, %4, %cst {dimension_numbers = #tpu.dot_dimension_numbers<[1], [0], [0], [1], [0, 0, 1, 1], [], []>} : vector<16x32xbf16>, vector<32x128xbf16>, vector<16x128xf32> -> vector<16x128xf32>
    %c0_4 = arith.constant 0 : index
    %c0_5 = arith.constant 0 : index
    %6 = vector.load %arg6[%c0_4, %c0_5] : memref<16x128xf32, #tpu.memory_space<vmem>>, vector<16x128xf32>
    tpu.vector_store %arg6[%c0_4, %c0_5], %5 {strides = array<i32>} : memref<16x128xf32, #tpu.memory_space<vmem>>, vector<16x128xf32>,
    return
  }
  func.func @transform_0(%arg0: i32, %arg1: i32) -> (i32, i32) {
    %c0_i32 = arith.constant 0 : i32
    %c0_i32_0 = arith.constant 0 : i32
    return %arg0, %c0_i32 : i32, i32
  }
  func.func @transform_1(%arg0: i32, %arg1: i32) -> (i32, i32) {
    %c0_i32 = arith.constant 0 : i32
    %c0_i32_0 = arith.constant 0 : i32
    %c0_i32_1 = arith.constant 0 : i32
    return %c0_i32, %c0_i32_0 : i32, i32
  }
  func.func @transform_2(%arg0: i32, %arg1: i32) -> (i32, i32) {
    %c0_i32 = arith.constant 0 : i32
    %c0_i32_0 = arith.constant 0 : i32
    %c0_i32_1 = arith.constant 0 : i32
    return %c0_i32, %c0_i32_0 : i32, i32
  }
  func.func @transform_3(%arg0: i32, %arg1: i32) -> (i32, i32) {
    %c0_i32 = arith.constant 0 : i32
    %c0_i32_0 = arith.constant 0 : i32
    return %c0_i32, %arg1 : i32, i32
  }
  func.func @transform_4(%arg0: i32, %arg1: i32) -> (i32, i32) {
    %c0_i32 = arith.constant 0 : i32
    return %arg0, %arg1 : i32, i32
  }
}

module attributes {stable_mosaic.version = 11 : i64} {
  func.func @stack_kernel(%arg0: i32, %arg1: i32, %arg2: memref<2x8x32xf32, #tpu.memory_space<vmem>>, %arg3: memref<1x1x32xf32, #tpu.memory_space<vmem>>, %arg4: memref<1x1x32xf32, #tpu.memory_space<vmem>>, %arg5: memref<1x32x96xbf16, #tpu.memory_space<vmem>>, %arg6: memref<1x1x96xf32, #tpu.memory_space<vmem>>, %arg7: memref<1x32x32xbf16, #tpu.memory_space<vmem>>, %arg8: memref<1x1x32xf32, #tpu.memory_space<vmem>>, %arg9: memref<1x1x32xf32, #tpu.memory_space<vmem>>, %arg10: memref<1x1x32xf32, #tpu.memory_space<vmem>>, %arg11: memref<1x32x128xbf16, #tpu.memory_space<vmem>>, %arg12: memref<1x1x128xf32, #tpu.memory_space<vmem>>, %arg13: memref<1x128x32xbf16, #tpu.memory_space<vmem>>, %arg14: memref<1x1x32xf32, #tpu.memory_space<vmem>>, %arg15: memref<2x8x32xf32, #tpu.memory_space<vmem>>) attributes {dimension_semantics = [#tpu.dimension_semantics<parallel>, #tpu.dimension_semantics<arbitrary>], iteration_bounds = array<i64: 1, 2>, scalar_prefetch = 0 : i64, scratch_operands = 0 : i64, tpu.core_type = #tpu.core_type<tc>, window_params = [{transform_indices = @transform_0, window_bounds = array<i64: 2, 8, 32>}, {transform_indices = @transform_1, window_bounds = array<i64: 1, 1, 32>}, {transform_indices = @transform_2, window_bounds = array<i64: 1, 1, 32>}, {transform_indices = @transform_3, window_bounds = array<i64: 1, 32, 96>}, {transform_indices = @transform_4, window_bounds = array<i64: 1, 1, 96>}, {transform_indices = @transform_5, window_bounds = array<i64: 1, 32, 32>}, {transform_indices = @transform_6, window_bounds = array<i64: 1, 1, 32>}, {transform_indices = @transform_7, window_bounds = array<i64: 1, 1, 32>}, {transform_indices = @transform_8, window_bounds = array<i64: 1, 1, 32>}, {transform_indices = @transform_9, window_bounds = array<i64: 1, 32, 128>}, {transform_indices = @transform_10, window_bounds = array<i64: 1, 1, 128>}, {transform_indices = @transform_11, window_bounds = array<i64: 1, 128, 32>}, {transform_indices = @transform_12, window_bounds = array<i64: 1, 1, 32>}, {transform_indices = @transform_13, window_bounds = array<i64: 2, 8, 32>}]} {
    %c0_i32 = arith.constant 0 : i32
    %0 = arith.cmpi eq, %arg1, %c0_i32 : i32
    %1 = arith.extui %0 : i1 to i32
    %c0_i32_0 = arith.constant 0 : i32
    %2 = arith.cmpi ne, %1, %c0_i32_0 : i32
    scf.if %2 {
      %c0_65 = arith.constant 0 : index
      %c0_66 = arith.constant 0 : index
      %c0_67 = arith.constant 0 : index
      %144 = vector.load %arg2[%c0_65, %c0_66, %c0_67] : memref<2x8x32xf32, #tpu.memory_space<vmem>>, vector<2x8x32xf32>
      %c0_68 = arith.constant 0 : index
      %c0_69 = arith.constant 0 : index
      %c0_70 = arith.constant 0 : index
      %145 = vector.load %arg15[%c0_68, %c0_69, %c0_70] : memref<2x8x32xf32, #tpu.memory_space<vmem>>, vector<2x8x32xf32>
      tpu.vector_store %arg15[%c0_68, %c0_69, %c0_70], %144 {strides = array<i32>} : memref<2x8x32xf32, #tpu.memory_space<vmem>>, vector<2x8x32xf32>,
    } else {
    }
    %c0 = arith.constant 0 : index
    %c0_1 = arith.constant 0 : index
    %c0_2 = arith.constant 0 : index
    %3 = vector.load %arg15[%c0, %c0_1, %c0_2] : memref<2x8x32xf32, #tpu.memory_space<vmem>>, vector<2x8x32xf32>
    %4 = vector.shape_cast %3 : vector<2x8x32xf32> to vector<16x32xf32>
    %c0_3 = arith.constant 0 : index
    %c0_4 = arith.constant 0 : index
    %c0_5 = arith.constant 0 : index
    %5 = vector.load %arg3[%c0_3, %c0_4, %c0_5] : memref<1x1x32xf32, #tpu.memory_space<vmem>>, vector<1x1x32xf32>
    %6 = vector.shape_cast %5 : vector<1x1x32xf32> to vector<1x32xf32>
    %c0_6 = arith.constant 0 : index
    %c0_7 = arith.constant 0 : index
    %c0_8 = arith.constant 0 : index
    %7 = vector.load %arg4[%c0_6, %c0_7, %c0_8] : memref<1x1x32xf32, #tpu.memory_space<vmem>>, vector<1x1x32xf32>
    %8 = vector.shape_cast %7 : vector<1x1x32xf32> to vector<1x32xf32>
    %c0_9 = arith.constant 0 : index
    %c0_10 = arith.constant 0 : index
    %c0_11 = arith.constant 0 : index
    %9 = vector.load %arg5[%c0_9, %c0_10, %c0_11] : memref<1x32x96xbf16, #tpu.memory_space<vmem>>, vector<1x32x96xbf16>
    %10 = vector.shape_cast %9 : vector<1x32x96xbf16> to vector<32x96xbf16>
    %c0_12 = arith.constant 0 : index
    %c0_13 = arith.constant 0 : index
    %c0_14 = arith.constant 0 : index
    %11 = vector.load %arg6[%c0_12, %c0_13, %c0_14] : memref<1x1x96xf32, #tpu.memory_space<vmem>>, vector<1x1x96xf32>
    %12 = vector.shape_cast %11 : vector<1x1x96xf32> to vector<1x96xf32>
    %c0_15 = arith.constant 0 : index
    %c0_16 = arith.constant 0 : index
    %c0_17 = arith.constant 0 : index
    %13 = vector.load %arg7[%c0_15, %c0_16, %c0_17] : memref<1x32x32xbf16, #tpu.memory_space<vmem>>, vector<1x32x32xbf16>
    %14 = vector.shape_cast %13 : vector<1x32x32xbf16> to vector<32x32xbf16>
    %c0_18 = arith.constant 0 : index
    %c0_19 = arith.constant 0 : index
    %c0_20 = arith.constant 0 : index
    %15 = vector.load %arg8[%c0_18, %c0_19, %c0_20] : memref<1x1x32xf32, #tpu.memory_space<vmem>>, vector<1x1x32xf32>
    %16 = vector.shape_cast %15 : vector<1x1x32xf32> to vector<1x32xf32>
    %c0_21 = arith.constant 0 : index
    %c0_22 = arith.constant 0 : index
    %c0_23 = arith.constant 0 : index
    %17 = vector.load %arg9[%c0_21, %c0_22, %c0_23] : memref<1x1x32xf32, #tpu.memory_space<vmem>>, vector<1x1x32xf32>
    %18 = vector.shape_cast %17 : vector<1x1x32xf32> to vector<1x32xf32>
    %c0_24 = arith.constant 0 : index
    %c0_25 = arith.constant 0 : index
    %c0_26 = arith.constant 0 : index
    %19 = vector.load %arg10[%c0_24, %c0_25, %c0_26] : memref<1x1x32xf32, #tpu.memory_space<vmem>>, vector<1x1x32xf32>
    %20 = vector.shape_cast %19 : vector<1x1x32xf32> to vector<1x32xf32>
    %c0_27 = arith.constant 0 : index
    %c0_28 = arith.constant 0 : index
    %c0_29 = arith.constant 0 : index
    %21 = vector.load %arg11[%c0_27, %c0_28, %c0_29] : memref<1x32x128xbf16, #tpu.memory_space<vmem>>, vector<1x32x128xbf16>
    %22 = vector.shape_cast %21 : vector<1x32x128xbf16> to vector<32x128xbf16>
    %c0_30 = arith.constant 0 : index
    %c0_31 = arith.constant 0 : index
    %c0_32 = arith.constant 0 : index
    %23 = vector.load %arg12[%c0_30, %c0_31, %c0_32] : memref<1x1x128xf32, #tpu.memory_space<vmem>>, vector<1x1x128xf32>
    %24 = vector.shape_cast %23 : vector<1x1x128xf32> to vector<1x128xf32>
    %c0_33 = arith.constant 0 : index
    %c0_34 = arith.constant 0 : index
    %c0_35 = arith.constant 0 : index
    %25 = vector.load %arg13[%c0_33, %c0_34, %c0_35] : memref<1x128x32xbf16, #tpu.memory_space<vmem>>, vector<1x128x32xbf16>
    %26 = vector.shape_cast %25 : vector<1x128x32xbf16> to vector<128x32xbf16>
    %c0_36 = arith.constant 0 : index
    %c0_37 = arith.constant 0 : index
    %c0_38 = arith.constant 0 : index
    %27 = vector.load %arg14[%c0_36, %c0_37, %c0_38] : memref<1x1x32xf32, #tpu.memory_space<vmem>>, vector<1x1x32xf32>
    %28 = vector.shape_cast %27 : vector<1x1x32xf32> to vector<1x32xf32>
    %cst = arith.constant dense<0.000000e+00> : vector<16xf32>
    %29 = vector.multi_reduction <add>, %4, %cst [1] : vector<16x32xf32> to vector<16xf32>
    %30 = vector.shape_cast %29 : vector<16xf32> to vector<16x1xf32>
    %cst_39 = arith.constant 3.200000e+01 : f32
    %31 = vector.broadcast %cst_39 : f32 to vector<16x1xf32>
    %32 = arith.divf %30, %31 : vector<16x1xf32>
    %33 = vector.broadcast %32 : vector<16x1xf32> to vector<16x32xf32>
    %34 = arith.subf %4, %33 : vector<16x32xf32>
    %35 = arith.mulf %34, %34 : vector<16x32xf32>
    %cst_40 = arith.constant dense<0.000000e+00> : vector<16xf32>
    %36 = vector.multi_reduction <add>, %35, %cst_40 [1] : vector<16x32xf32> to vector<16xf32>
    %37 = vector.shape_cast %36 : vector<16xf32> to vector<16x1xf32>
    %cst_41 = arith.constant 3.200000e+01 : f32
    %38 = vector.broadcast %cst_41 : f32 to vector<16x1xf32>
    %39 = arith.divf %37, %38 : vector<16x1xf32>
    %cst_42 = arith.constant 9.99999974E-6 : f32
    %40 = vector.broadcast %cst_42 : f32 to vector<16x1xf32>
    %41 = arith.addf %39, %40 : vector<16x1xf32>
    %42 = math.rsqrt %41 : vector<16x1xf32>
    %43 = vector.broadcast %42 : vector<16x1xf32> to vector<16x32xf32>
    %44 = arith.mulf %34, %43 : vector<16x32xf32>
    %45 = vector.broadcast %6 : vector<1x32xf32> to vector<16x32xf32>
    %46 = arith.mulf %44, %45 : vector<16x32xf32>
    %47 = vector.broadcast %8 : vector<1x32xf32> to vector<16x32xf32>
    %48 = arith.addf %46, %47 : vector<16x32xf32>
    %49 = arith.truncf %48 : vector<16x32xf32> to vector<16x32xbf16>
    %cst_43 = arith.constant dense<0.000000e+00> : vector<16x96xf32>
    %50 = tpu.matmul %49, %10, %cst_43 {dimension_numbers = #tpu.dot_dimension_numbers<[1], [0], [0], [1], [0, 0, 1, 1], [], []>} : vector<16x32xbf16>, vector<32x96xbf16>, vector<16x96xf32> -> vector<16x96xf32>
    %51 = vector.broadcast %12 : vector<1x96xf32> to vector<16x96xf32>
    %52 = arith.addf %50, %51 : vector<16x96xf32>
    %53 = vector.shape_cast %52 : vector<16x96xf32> to vector<2x8x96xf32>
    %54 = vector.extract_strided_slice %53 {offsets = [0, 0, 0], sizes = [2, 8, 32], strides = [1, 1, 1]} : vector<2x8x96xf32> to vector<2x8x32xf32>
    %55 = arith.truncf %54 : vector<2x8x32xf32> to vector<2x8x32xbf16>
    %56 = vector.shape_cast %55 : vector<2x8x32xbf16> to vector<2x8x4x8xbf16>
    %57 = tpu.transpose %56, [0, 2, 1, 3] : vector<2x8x4x8xbf16> -> vector<2x4x8x8xbf16>
    %58 = vector.shape_cast %57 : vector<2x4x8x8xbf16> to vector<8x8x8xbf16>
    %59 = vector.extract_strided_slice %53 {offsets = [0, 0, 32], sizes = [2, 8, 32], strides = [1, 1, 1]} : vector<2x8x96xf32> to vector<2x8x32xf32>
    %60 = arith.truncf %59 : vector<2x8x32xf32> to vector<2x8x32xbf16>
    %61 = vector.shape_cast %60 : vector<2x8x32xbf16> to vector<2x8x4x8xbf16>
    %62 = tpu.transpose %61, [0, 2, 1, 3] : vector<2x8x4x8xbf16> -> vector<2x4x8x8xbf16>
    %63 = vector.shape_cast %62 : vector<2x4x8x8xbf16> to vector<8x8x8xbf16>
    %64 = vector.extract_strided_slice %53 {offsets = [0, 0, 64], sizes = [2, 8, 32], strides = [1, 1, 1]} : vector<2x8x96xf32> to vector<2x8x32xf32>
    %65 = arith.truncf %64 : vector<2x8x32xf32> to vector<2x8x32xbf16>
    %66 = vector.shape_cast %65 : vector<2x8x32xbf16> to vector<2x8x4x8xbf16>
    %67 = tpu.transpose %66, [0, 2, 1, 3] : vector<2x8x4x8xbf16> -> vector<2x4x8x8xbf16>
    %68 = vector.shape_cast %67 : vector<2x4x8x8xbf16> to vector<8x8x8xbf16>
    "tpu.trace_start"() <{level = 10 : i32, message = "gqd,gkd->gqk"}> : () -> ()
    %cst_44 = arith.constant dense<0.000000e+00> : vector<8x8x8xf32>
    %69 = tpu.matmul %58, %63, %cst_44 {dimension_numbers = #tpu.dot_dimension_numbers<[2], [2], [1], [1], [0, 0, 0, 1, 1, 1], [0], [0]>} : vector<8x8x8xbf16>, vector<8x8x8xbf16>, vector<8x8x8xf32> -> vector<8x8x8xf32>
    "tpu.trace_stop"() : () -> ()
    %70 = tpu.iota {dimensions = array<i32: 0>} : vector<8x8xi32>
    %c0_i32_45 = arith.constant 0 : i32
    %71 = vector.broadcast %c0_i32_45 : i32 to vector<8x8xi32>
    %72 = arith.addi %70, %71 : vector<8x8xi32>
    %73 = tpu.iota {dimensions = array<i32: 1>} : vector<8x8xi32>
    %74 = arith.cmpi sge, %72, %73 : vector<8x8xi32>
    %75 = vector.shape_cast %74 : vector<8x8xi1> to vector<1x8x8xi1>
    %cst_46 = arith.constant -1.000000e+30 : f32
    %76 = vector.shape_cast %75 : vector<1x8x8xi1> to vector<1x8x8xi1>
    %77 = vector.broadcast %76 : vector<1x8x8xi1> to vector<8x8x8xi1>
    %78 = vector.broadcast %cst_46 : f32 to vector<8x8x8xf32>
    %79 = arith.select %77, %69, %78 : vector<8x8x8xi1>, vector<8x8x8xf32>
    %cst_47 = arith.constant dense<0xFF800000> : vector<8x8xf32>
    %80 = vector.multi_reduction <maximumf>, %79, %cst_47 [2] : vector<8x8x8xf32> to vector<8x8xf32>
    %81 = vector.shape_cast %80 : vector<8x8xf32> to vector<8x8x1xf32>
    %82 = vector.broadcast %81 : vector<8x8x1xf32> to vector<8x8x8xf32>
    %83 = arith.subf %79, %82 : vector<8x8x8xf32>
    %84 = math.exp %83 : vector<8x8x8xf32>
    %cst_48 = arith.constant dense<0.000000e+00> : vector<8x8xf32>
    %85 = vector.multi_reduction <add>, %84, %cst_48 [2] : vector<8x8x8xf32> to vector<8x8xf32>
    %86 = vector.shape_cast %85 : vector<8x8xf32> to vector<8x8x1xf32>
    %87 = tpu.reciprocal %86 {approx = true} : vector<8x8x1xf32> -> vector<8x8x1xf32>
    %88 = vector.broadcast %87 : vector<8x8x1xf32> to vector<8x8x8xf32>
    %89 = arith.mulf %84, %88 : vector<8x8x8xf32>
    %90 = arith.truncf %89 : vector<8x8x8xf32> to vector<8x8x8xbf16>
    "tpu.trace_start"() <{level = 10 : i32, message = "gqk,gkd->gqd"}> : () -> ()
    %cst_49 = arith.constant dense<0.000000e+00> : vector<8x8x8xf32>
    %91 = tpu.matmul %90, %68, %cst_49 {dimension_numbers = #tpu.dot_dimension_numbers<[2], [1], [1], [2], [0, 0, 0, 1, 1, 2], [0], [0]>} : vector<8x8x8xbf16>, vector<8x8x8xbf16>, vector<8x8x8xf32> -> vector<8x8x8xf32>
    "tpu.trace_stop"() : () -> ()
    %92 = vector.shape_cast %91 : vector<8x8x8xf32> to vector<2x4x8x8xf32>
    %93 = tpu.transpose %92, [0, 2, 1, 3] : vector<2x4x8x8xf32> -> vector<2x8x4x8xf32>
    %94 = vector.shape_cast %93 : vector<2x8x4x8xf32> to vector<16x32xf32>
    %95 = arith.truncf %94 : vector<16x32xf32> to vector<16x32xbf16>
    %cst_50 = arith.constant dense<0.000000e+00> : vector<16x32xf32>
    %96 = tpu.matmul %95, %14, %cst_50 {dimension_numbers = #tpu.dot_dimension_numbers<[1], [0], [0], [1], [0, 0, 1, 1], [], []>} : vector<16x32xbf16>, vector<32x32xbf16>, vector<16x32xf32> -> vector<16x32xf32>
    %97 = vector.broadcast %16 : vector<1x32xf32> to vector<16x32xf32>
    %98 = arith.addf %96, %97 : vector<16x32xf32>
    %99 = arith.addf %4, %98 : vector<16x32xf32>
    %cst_51 = arith.constant dense<0.000000e+00> : vector<16xf32>
    %100 = vector.multi_reduction <add>, %99, %cst_51 [1] : vector<16x32xf32> to vector<16xf32>
    %101 = vector.shape_cast %100 : vector<16xf32> to vector<16x1xf32>
    %cst_52 = arith.constant 3.200000e+01 : f32
    %102 = vector.broadcast %cst_52 : f32 to vector<16x1xf32>
    %103 = arith.divf %101, %102 : vector<16x1xf32>
    %104 = vector.broadcast %103 : vector<16x1xf32> to vector<16x32xf32>
    %105 = arith.subf %99, %104 : vector<16x32xf32>
    %106 = arith.mulf %105, %105 : vector<16x32xf32>
    %cst_53 = arith.constant dense<0.000000e+00> : vector<16xf32>
    %107 = vector.multi_reduction <add>, %106, %cst_53 [1] : vector<16x32xf32> to vector<16xf32>
    %108 = vector.shape_cast %107 : vector<16xf32> to vector<16x1xf32>
    %cst_54 = arith.constant 3.200000e+01 : f32
    %109 = vector.broadcast %cst_54 : f32 to vector<16x1xf32>
    %110 = arith.divf %108, %109 : vector<16x1xf32>
    %cst_55 = arith.constant 9.99999974E-6 : f32
    %111 = vector.broadcast %cst_55 : f32 to vector<16x1xf32>
    %112 = arith.addf %110, %111 : vector<16x1xf32>
    %113 = math.rsqrt %112 : vector<16x1xf32>
    %114 = vector.broadcast %113 : vector<16x1xf32> to vector<16x32xf32>
    %115 = arith.mulf %105, %114 : vector<16x32xf32>
    %116 = vector.broadcast %18 : vector<1x32xf32> to vector<16x32xf32>
    %117 = arith.mulf %115, %116 : vector<16x32xf32>
    %118 = vector.broadcast %20 : vector<1x32xf32> to vector<16x32xf32>
    %119 = arith.addf %117, %118 : vector<16x32xf32>
    %120 = arith.truncf %119 : vector<16x32xf32> to vector<16x32xbf16>
    %cst_56 = arith.constant dense<0.000000e+00> : vector<16x128xf32>
    %121 = tpu.matmul %120, %22, %cst_56 {dimension_numbers = #tpu.dot_dimension_numbers<[1], [0], [0], [1], [0, 0, 1, 1], [], []>} : vector<16x32xbf16>, vector<32x128xbf16>, vector<16x128xf32> -> vector<16x128xf32>
    %122 = vector.broadcast %24 : vector<1x128xf32> to vector<16x128xf32>
    %123 = arith.addf %121, %122 : vector<16x128xf32>
    %cst_57 = arith.constant 5.000000e-01 : f32
    %124 = vector.broadcast %cst_57 : f32 to vector<16x128xf32>
    %125 = arith.mulf %124, %123 : vector<16x128xf32>
    %cst_58 = arith.constant 4.471500e-02 : f32
    %126 = vector.broadcast %cst_58 : f32 to vector<16x128xf32>
    %127 = arith.mulf %126, %123 : vector<16x128xf32>
    %128 = arith.mulf %127, %123 : vector<16x128xf32>
    %129 = arith.mulf %128, %123 : vector<16x128xf32>
    %130 = arith.addf %123, %129 : vector<16x128xf32>
    %cst_59 = arith.constant 0.797884583 : f32
    %131 = vector.broadcast %cst_59 : f32 to vector<16x128xf32>
    %132 = arith.mulf %131, %130 : vector<16x128xf32>
    %133 = math.tanh %132 : vector<16x128xf32>
    %cst_60 = arith.constant 1.000000e+00 : f32
    %134 = vector.broadcast %cst_60 : f32 to vector<16x128xf32>
    %135 = arith.addf %134, %133 : vector<16x128xf32>
    %136 = arith.mulf %125, %135 : vector<16x128xf32>
    %137 = arith.truncf %136 : vector<16x128xf32> to vector<16x128xbf16>
    %cst_61 = arith.constant dense<0.000000e+00> : vector<16x32xf32>
    %138 = tpu.matmul %137, %26, %cst_61 {dimension_numbers = #tpu.dot_dimension_numbers<[1], [0], [0], [1], [0, 0, 1, 1], [], []>} : vector<16x128xbf16>, vector<128x32xbf16>, vector<16x32xf32> -> vector<16x32xf32>
    %139 = vector.broadcast %28 : vector<1x32xf32> to vector<16x32xf32>
    %140 = arith.addf %138, %139 : vector<16x32xf32>
    %141 = arith.addf %99, %140 : vector<16x32xf32>
    %142 = vector.shape_cast %141 : vector<16x32xf32> to vector<2x8x32xf32>
    %c0_62 = arith.constant 0 : index
    %c0_63 = arith.constant 0 : index
    %c0_64 = arith.constant 0 : index
    %143 = vector.load %arg15[%c0_62, %c0_63, %c0_64] : memref<2x8x32xf32, #tpu.memory_space<vmem>>, vector<2x8x32xf32>
    tpu.vector_store %arg15[%c0_62, %c0_63, %c0_64], %142 {strides = array<i32>} : memref<2x8x32xf32, #tpu.memory_space<vmem>>, vector<2x8x32xf32>,
    return
  }
  func.func @transform_0(%arg0: i32, %arg1: i32) -> (i32, i32, i32) {
    %c0_i32 = arith.constant 0 : i32
    %c0_i32_0 = arith.constant 0 : i32
    %c0_i32_1 = arith.constant 0 : i32
    return %arg0, %c0_i32, %c0_i32_0 : i32, i32, i32
  }
  func.func @transform_1(%arg0: i32, %arg1: i32) -> (i32, i32, i32) {
    %c0_i32 = arith.constant 0 : i32
    %c0_i32_0 = arith.constant 0 : i32
    %c0_i32_1 = arith.constant 0 : i32
    return %arg1, %c0_i32, %c0_i32_0 : i32, i32, i32
  }
  func.func @transform_2(%arg0: i32, %arg1: i32) -> (i32, i32, i32) {
    %c0_i32 = arith.constant 0 : i32
    %c0_i32_0 = arith.constant 0 : i32
    %c0_i32_1 = arith.constant 0 : i32
    return %arg1, %c0_i32, %c0_i32_0 : i32, i32, i32
  }
  func.func @transform_3(%arg0: i32, %arg1: i32) -> (i32, i32, i32) {
    %c0_i32 = arith.constant 0 : i32
    %c0_i32_0 = arith.constant 0 : i32
    %c0_i32_1 = arith.constant 0 : i32
    return %arg1, %c0_i32, %c0_i32_0 : i32, i32, i32
  }
  func.func @transform_4(%arg0: i32, %arg1: i32) -> (i32, i32, i32) {
    %c0_i32 = arith.constant 0 : i32
    %c0_i32_0 = arith.constant 0 : i32
    %c0_i32_1 = arith.constant 0 : i32
    return %arg1, %c0_i32, %c0_i32_0 : i32, i32, i32
  }
  func.func @transform_5(%arg0: i32, %arg1: i32) -> (i32, i32, i32) {
    %c0_i32 = arith.constant 0 : i32
    %c0_i32_0 = arith.constant 0 : i32
    %c0_i32_1 = arith.constant 0 : i32
    return %arg1, %c0_i32, %c0_i32_0 : i32, i32, i32
  }
  func.func @transform_6(%arg0: i32, %arg1: i32) -> (i32, i32, i32) {
    %c0_i32 = arith.constant 0 : i32
    %c0_i32_0 = arith.constant 0 : i32
    %c0_i32_1 = arith.constant 0 : i32
    return %arg1, %c0_i32, %c0_i32_0 : i32, i32, i32
  }
  func.func @transform_7(%arg0: i32, %arg1: i32) -> (i32, i32, i32) {
    %c0_i32 = arith.constant 0 : i32
    %c0_i32_0 = arith.constant 0 : i32
    %c0_i32_1 = arith.constant 0 : i32
    return %arg1, %c0_i32, %c0_i32_0 : i32, i32, i32
  }
  func.func @transform_8(%arg0: i32, %arg1: i32) -> (i32, i32, i32) {
    %c0_i32 = arith.constant 0 : i32
    %c0_i32_0 = arith.constant 0 : i32
    %c0_i32_1 = arith.constant 0 : i32
    return %arg1, %c0_i32, %c0_i32_0 : i32, i32, i32
  }
  func.func @transform_9(%arg0: i32, %arg1: i32) -> (i32, i32, i32) {
    %c0_i32 = arith.constant 0 : i32
    %c0_i32_0 = arith.constant 0 : i32
    %c0_i32_1 = arith.constant 0 : i32
    return %arg1, %c0_i32, %c0_i32_0 : i32, i32, i32
  }
  func.func @transform_10(%arg0: i32, %arg1: i32) -> (i32, i32, i32) {
    %c0_i32 = arith.constant 0 : i32
    %c0_i32_0 = arith.constant 0 : i32
    %c0_i32_1 = arith.constant 0 : i32
    return %arg1, %c0_i32, %c0_i32_0 : i32, i32, i32
  }
  func.func @transform_11(%arg0: i32, %arg1: i32) -> (i32, i32, i32) {
    %c0_i32 = arith.constant 0 : i32
    %c0_i32_0 = arith.constant 0 : i32
    %c0_i32_1 = arith.constant 0 : i32
    return %arg1, %c0_i32, %c0_i32_0 : i32, i32, i32
  }
  func.func @transform_12(%arg0: i32, %arg1: i32) -> (i32, i32, i32) {
    %c0_i32 = arith.constant 0 : i32
    %c0_i32_0 = arith.constant 0 : i32
    %c0_i32_1 = arith.constant 0 : i32
    return %arg1, %c0_i32, %c0_i32_0 : i32, i32, i32
  }
  func.func @transform_13(%arg0: i32, %arg1: i32) -> (i32, i32, i32) {
    %c0_i32 = arith.constant 0 : i32
    %c0_i32_0 = arith.constant 0 : i32
    %c0_i32_1 = arith.constant 0 : i32
    return %arg0, %c0_i32, %c0_i32_0 : i32, i32, i32
  }
}

</mosaic_0001>

<bundles_post_ra>
// kernel: gpt_forward.3
= control target key start
LH: loop header
LB: loop body
LE: loop exit
PB: predicated region body
PF: predicated region fallthrough
CT: control target
= control target key end

     0   :  { %vm27_vm0 = vcmask 261120   ;;  %s270_s0 = inlined_call_operand.vmem [shape: f32[16,32], index: 0, kind: input, shape index: {}]   ;;  %s271_s1 = inlined_call_operand.vmem [shape: f32[1,32], index: 1, kind: input, shape index: {}]   ;;  %s272_s2 = inlined_call_operand.vmem [shape: f32[1,32], index: 2, kind: input, shape index: {}]   ;;  %s273_s3 = inlined_call_operand.vmem [shape: bf16[32,128], index: 3, kind: input, shape index: {}]   ;;  %s274_s4 = inlined_call_operand.hbm [shape: f32[16,128], index: 4, kind: output, shape index: {}]  }
   0x1   :  { %v23_v0 = vld [vmem:[%s270_s0] sm:$0xff]  ;;  %v24_v1 = vld [vmem:[%s270_s0 + $0x8] sm:$0xff] }
   0x2   :  { %v28_v2 = vsel %vm27_vm0, %v23_v0, 0.0 }
   0x3   :  { %29 = vadd.xlane.f32.xlu0 %v28_v2 }
   0x4   :  { %9 = vsyncpa [#allocation4], 0  ;;  %v31_v3 = vsel %vm27_vm0, %v24_v1, 0.0  ;;  %v174_v14 = vld [vmem:[%s273_s3] sm:$0xff]   ;;  %v204_v15 = vmov 0.0   ;;  %v175_v16 = vld [vmem:[%s273_s3 + $0x8] sm:$0xff]  }
   0x5   :  { %161 = vmatprep.subr.bf16.mxu0 %v204_v15  ;;  %vm205_vm1 = vmmov 0   ;;  %v153_v25 = vld [vmem:[%s271_s1] ss:$0 sm:$0xff]  ;;  %s206_s25 = smov [#allocation3]  }
   0x6   :  { %162 = vmatpush3.bf16.msra.mxu0 %v174_v14  ;;  %165 = vmatprep.mubr.msk.bf16.mxu0 %vm205_vm1, %v204_v15  ;;  %v154_v29 = vld [vmem:[%s272_s2] ss:$0 sm:$0xff]  ;;  %s142_s26 = sshll.u32 %s206_s25, 4  ;;  %s143_s26 = int_to_ptr.vmem [resolvable:$true] %s142_s26 }
   0x7   :  { %32 = vadd.xlane.f32.xlu0 %v31_v3  ;;  %163 = vmatprep.subr.bf16.mxu0 %v204_v15  ;;  %s180_s1 = scalar_lea.vmem %s143_s26, 256  ;;  %p185_p1 = scmp.lt.s32.totalorder %s143_s26, %s143_s26 }
   0x8   :  { %p181_p0 = scmp.ne.s32.totalorder %s143_s26, %s180_s1  ;;  %p186_p2 = scmp.lt.s32.totalorder %s180_s1, %s180_s1 }
   0xa   :  { %164 = vmatpush3.bf16.msra.mxu0 %v175_v16  ;;  %p187_p3 = por %p186_p2, %p185_p1 }
   0xc   :  { %p188_p4 = pnand %p187_p3, %p181_p0 }
  0x90   :  { %v30_v4 = vpop.xlane.xlu0 %29 }
  0x91   :  { %v35_v5 = vmul.f32 0.03125, %v30_v4 }
  0x93   :  { %v37_v6 = vsub.f32 %v23_v0, %v35_v5 }
  0x94   :  { %v33_v7 = vpop.xlane.xlu0 %32 }
  0x95   :  { %v36_v8 = vmul.f32 0.03125, %v33_v7  ;;  %v39_v9 = vmul.f32 %v37_v6, %v37_v6 }
  0x97   :  { %v38_v10 = vsub.f32 %v24_v1, %v36_v8  ;;  %v41_v11 = vsel %vm27_vm0, %v39_v9, 0.0 }
  0x98   :  { %42 = vadd.xlane.f32.xlu1 %v41_v11 }
  0x99   :  { %v40_v12 = vmul.f32 %v38_v10, %v38_v10 }
  0x9b   :  { %v44_v13 = vsel %vm27_vm0, %v40_v12, 0.0 }
  0x9c   :  { %45 = vadd.xlane.f32.xlu1 %v44_v13 }
 0x125   :  { %v43_v17 = vpop.xlane.xlu1 %42 }
 0x126   :  { %v47_v18 = vmul.f32 0.03125, %v43_v17 }
 0x128   :  { %v49_v19 = vadd.f32 1e-05, %v47_v18 }
 0x129   :  { %v46_v20 = vpop.xlane.xlu1 %45 }
 0x12a   :  { %176 = vrsqrt.f32 %v49_v19  ;;  %v48_v21 = vmul.f32 0.03125, %v46_v20 }
 0x12c   :  { %v50_v22 = vadd.f32 1e-05, %v48_v21 }
 0x12e   :  { %178 = vrsqrt.f32 %v50_v22 }
 0x134   :  { %v177_v23 = vpop.eup %176 }
 0x135   :  { %v53_v24 = vmul.f32 %v177_v23, %v37_v6 }
 0x137   :  { %v61_v27 = vmul.f32 %v153_v25, %v53_v24 }
 0x138   :  { %v179_v26 = vpop.eup %178 }
 0x139   :  { %v54_v28 = vmul.f32 %v179_v26, %v38_v10  ;;  %v69_v31 = vadd.f32 %v154_v29, %v61_v27 }
 0x13b   :  { %v62_v30 = vmul.f32 %v153_v25, %v54_v28 }
 0x13d   :  { %v70_v32 = vadd.f32 %v154_v29, %v62_v30 }
 0x13f   :  { %v71_v33 = vpack.c.bf16 %v70_v32, %v69_v31 }
 0x141   :  { %72 = vst.msk [vmem:[#allocation2] sm:$0xff] %vm27_vm0, %v71_v33 }
 0x148   :  { %v73_v34 = vld [vmem:[#allocation2] sm:$0xff] }
 0x149   :  { %166 = vmatmul.mubr.msk.bf16.vlgmr.msra.gmra.mrb[0].mxu0 %vm27_vm0, %v73_v34 }
 0x21c   :  { %v128_v35 = vpop.f32.mrb[0].mxu0 }
 0x21d   :  { %135 = vst [vmem:[#allocation3] sm:$0xff] %v128_v35  ;;  %v167_v36 = vpop.f32.mrb[1].mxu0 }
 0x21e   :  { %v131_v37 = vpop.f32.mrb[2].mxu0 }
 0x21f   :  { %136 = vst [vmem:[#allocation3 + $0x8] sm:$0xff] %v131_v37  ;;  %v168_v38 = vpop.f32.mrb[3].mxu0 }
 0x220   :  { %191 = shalt.err (!%p188_p4)
}
 0x221   :  { %s192_s28 = scalar_lea.hbm %s274_s4, 256 }
 0x222   :  { %p193_p5 = scmp.ne.s32.totalorder %s274_s4, %s192_s28  ;;  %p196_p6 = scmp.lt.u32.totalorder %s192_s28, %s274_s4 }
 0x224   :  { %p198_p7 = pnand %p196_p6, %p193_p5 }
 0x226   :  { %201 = shalt.err (!%p198_p7)
}
 0x227   :  { %s207_s7 = smov 128   ;;  %s208_s8 = smov 8  }
 0x228   :  { %148 = dma.vmem_to_hbm [thread:$0]  %s143_s26, 256, %s274_s4, [#allocation4], %s207_s7, %s207_s7, %s208_s8  }
 0x229   :  { %202 = dma.done.wait [#allocation4], 256  }
 0x22a   :  { %203 = vsyncadd [#allocation4], 4294967040 }
 0x22b   :  { %152 = vsyncpa [#allocation4], 1 }

// kernel: gpt_forward.2
= control target key start
LH: loop header
LB: loop body
LE: loop exit
PB: predicated region body
PF: predicated region fallthrough
CT: control target
= control target key end

     0   :  { %s3923_s25 = smov 0   ;;  %s3925_s26 = smov 0   ;;  %s4597_s0 = inlined_call_operand.vmem [shape: f32[2,8,32], index: 0, kind: input, shape index: {}, may-alias: {0,13}]   ;;  %s4598_s1 = inlined_call_operand.vmem [shape: f32[2,1,32], index: 1, kind: input, shape index: {}]   ;;  %s4599_s2 = inlined_call_operand.vmem [shape: f32[2,1,32], index: 2, kind: input, shape index: {}]   ;;  %s4600_s3 = inlined_call_operand.vmem [shape: bf16[2,32,96], index: 3, kind: input, shape index: {}]   ;;  %s4601_s4 = inlined_call_operand.vmem [shape: f32[2,1,96], index: 4, kind: input, shape index: {}]   ;;  %s4602_s5 = inlined_call_operand.vmem [shape: bf16[2,32,32], index: 5, kind: input, shape index: {}]   ;;  %s4603_s6 = inlined_call_operand.vmem [shape: f32[2,1,32], index: 6, kind: input, shape index: {}]   ;;  %s4604_s7 = inlined_call_operand.vmem [shape: f32[2,1,32], index: 7, kind: input, shape index: {}]   ;;  %s4605_s8 = inlined_call_operand.vmem [shape: f32[2,1,32], index: 8, kind: input, shape index: {}]   ;;  %s4606_s9 = inlined_call_operand.vmem [shape: bf16[2,32,128], index: 9, kind: input, shape index: {}]   ;;  %s4607_s10 = inlined_call_operand.vmem [shape: f32[2,1,128], index: 10, kind: input, shape index: {}]   ;;  %s4608_s11 = inlined_call_operand.vmem [shape: bf16[2,128,32], index: 11, kind: input, shape index: {}]   ;;  %s4609_s12 = inlined_call_operand.vmem [shape: f32[2,1,32], index: 12, kind: input, shape index: {}]   ;;  %s4610_s13 = inlined_call_operand.vmem [shape: f32[2,8,32], index: 13, kind: output, shape index: {}, may-alias: {0,13}]  }
   0x1   :  { %4615 = sst [smem:[#allocation6_spill]] %s4599_s2  ;;  %s3927_s27 = smov 0  }
   0x2   :  { %4616 = sst [smem:[#allocation7_spill]] %s4600_s3 }
   0x3   :  { %4617 = sst [smem:[#allocation8_spill]] %s4602_s5 }
   0x4 LB: > { %4618 = sst [smem:[#allocation2_spill]] %s3834_s26  ;;  %s32_s28 = sadd.s32 1, %s3834_s26  ;;  %s3838_s27 = sphi %s3927_s27, %s23_s27   ;;  %s3834_s26 = sphi %s3925_s26, %s4636_s26   ;;  %s3830_s25 = sphi %s3923_s25, %s4635_s25  }
   0x5   : > { %4619 = sst [smem:[#allocation3_spill]] %s3838_s27  ;;  %p3451_p0 = scmp.ge.s32.totalorder %s3838_s27, 1 }
   0x6   : > { %p33_p1 = scmp.ge.s32.totalorder %s32_s28, 2  ;;  %p504_p2 = scmp.lt.s32.totalorder %s3838_s27, 3 }
   0x8   : > { %s4638_s28 = smov (%p33_p1, %s32_s28), 0  ;;  %p505_p3 = pnand %p3451_p0, %p504_p2 }
   0x9   : > { %4620 = sst [smem:[#allocation4_spill]] %s4638_s28 }
   0xa   : > { %508 = sbr.rel (%p505_p3) target bundleno = 2829 (0xb0d), region = 72 }
  0x11   : > { %p598_p4 = scmp.lt.s32.totalorder %s3830_s25, 1  ;;  %s4622_s3 = sld [smem:[#allocation7_spill]] }
  0x12   : > { %s4623_s5 = sld [smem:[#allocation8_spill]]  ;;  %p3460_p5 = scmp.ne.s32.totalorder %s3830_s25, 0 }
  0x13   : > { %s3941_s29 = scalar_select %p598_p4, %s3830_s25, 1 }
  0x14   : > { %652 = sbr.rel (%p3460_p5) target bundleno = 27 (0x1b), region = 76  ;;  %v653_v0 = vld [vmem:[%s4597_s0] sm:$0xff] (!%p3460_p5)  ;;  %vm655_vm0 = vcmask (!%p3460_p5), 261120   ;;  %v654_v1 = vld [vmem:[%s4597_s0 + $0x8] sm:$0xff] (!%p3460_p5) }
  0x15   : > { %s3510_s19 = sshll.u32 %s3941_s29, 4  ;;  %s622_s2 = scalar_lea.vmem %s4604_s7, %s3941_s29  ;;  %656 = vst.msk [vmem:[%s4610_s13] sm:$0xff] (!%p3460_p5), %vm655_vm0, %v653_v0  ;;  %657 = vst.msk [vmem:[%s4610_s13 + $0x8] sm:$0xff] (!%p3460_p5), %vm655_vm0, %v654_v1 }
  0x16   : > { %s625_s22 = scalar_lea.vmem %s4605_s8, %s3941_s29  ;;  %s641_s20 = scalar_lea.vmem %s4609_s12, %s3941_s29 }
  0x17   : > { %s3959_s30 = scalar_lea.vmem %s4622_s3, %s3510_s19  ;;  %s3981_s3 = scalar_lea.vmem %s4606_s9, %s3510_s19 }
  0x18   : > { %s3964_s26 = scalar_lea.vmem %s4623_s5, %s3510_s19  ;;  %s633_s5 = scalar_lea.vmem %s4607_s10, %s3941_s29 }
  0x19   : > { %4624 = sst [smem:[#allocation5_spill]] %s3964_s26  ;;  %s3513_s26 = sshll.u32 %s3941_s29, 6 }
  0x1a   : > { %s3991_s16 = scalar_lea.vmem %s4608_s11, %s3513_s26 }
  0x1b PF: > { %vm696_vm1 = vcmask 261120   ;;  %v3756_v16 = vld [vmem:[%s3959_s30] sm:$0xff]   ;;  %v3840_v17 = vmov 0.0   ;;  %v3757_v18 = vld [vmem:[%s3959_s30 + $0x8] sm:$0xff]   ;;  %vm3841_vm2 = vmmov 0   ;;  %s4625_s23 = scalar_lea.vmem %s4598_s1, %s3941_s29  ;;  %s4626_s28 = sld [smem:[#allocation6_spill]]  ;;  %v4614_v53 = vlaneseq }
  0x1c   : > { %v658_v2 = vld [vmem:[%s4610_s13] sm:$0xff]  ;;  %v659_v3 = vld [vmem:[%s4610_s13 + $0x8] sm:$0xff]  ;;  %3564 = vmatprep.subr.bf16.mxu0 %v3840_v17  ;;  %3584 = vmatprep.subr.bf16.mxu1 %v3840_v17  ;;  %s4628_s25 = scalar_lea.vmem %s4601_s4, %s3941_s29  ;;  %s3842_s15 = smov 112   ;;  %v3846_v51 = vmov 1983009808   ;;  %vm1821_vm3 = vcmask 64512  }
  0x1d   : > { %v697_v4 = vsel %vm696_vm1, %v658_v2, 0.0  ;;  %v700_v5 = vsel %vm696_vm1, %v659_v3, 0.0  ;;  %3565 = vmatpush3.bf16.msra.mxu0 %v3756_v16  ;;  %3568 = vmatprep.mubr.msk.bf16.mxu0 %vm3841_vm2, %v3840_v17  ;;  %v3461_v27 = vld [vmem:[%s4625_s23] ss:$0 sm:$0xff]  ;;  %s3843_s18 = smov 120   ;;  %s3844_s17 = smov 104   ;;  %v820_v52 = vunpack.c.l.s4 %v3846_v51 }
  0x1e   : > { %698 = vadd.xlane.f32.xlu0 %v697_v4  ;;  %3566 = vmatprep.subr.bf16.mxu0 %v3840_v17  ;;  %v3463_v36 = vld [vmem:[%s4628_s25] ss:$0 sm:$0xff]  ;;  %s3845_s30 = smov 96   ;;  %v4078_v55 = vshrl.u32 %v4614_v53, 7  ;;  %v3847_v57 = vmov 1934713408   ;;  %s4633_s27 = scalar_lea.vmem %s4603_s6, %s3941_s29 }
  0x1f   : > { %3586 = vmatprep.mubr.msk.bf16.mxu1 %vm3841_vm2, %v3840_v17  ;;  %v821_v54 = vunpack.c.0.s8 %v820_v52  ;;  %v837_v58 = vunpack.c.l.s4 %v3847_v57  ;;  %s3849_s21 = smov 64   ;;  %vm2304_vm5 = vcmask 1043456   ;;  %s4632_s23 = sld [smem:[#allocation5_spill]]  ;;  %vm2968_vm6 = vcmask 130048  }
  0x20   : > { %s3850_s19 = smov 16   ;;  %s3851_s24 = smov 8   ;;  %vm2971_vm7 = vcmask 195584  }
  0x21   : > { %3567 = vmatpush3.bf16.msra.mxu0 %v3757_v18  ;;  %s4627_s14 = scalar_lea.vmem %s4626_s28, %s3941_s29  ;;  %v4081_v56 = vsub.s32 %v821_v54, %v4078_v55  ;;  %v838_v60 = vunpack.c.0.s8 %v837_v58  ;;  %s3852_s28 = smov 24  }
  0x22   : > { %701 = vadd.xlane.f32.xlu0 %v700_v5  ;;  %3572 = vmatprep.subr.bf16.mxu0 %v3840_v17  ;;  %v3462_v31 = vld [vmem:[%s4627_s14] ss:$0 sm:$0xff] }
  0xab   : > { %v699_v6 = vpop.xlane.xlu0 %698 }
  0xac   : > { %v704_v7 = vmul.f32 0.03125, %v699_v6 }
  0xae   : > { %v706_v8 = vsub.f32 %v658_v2, %v704_v7  ;;  %v4092_v2 = vsub.s32 %v838_v60, %v4078_v55 }
  0xaf   : > { %v702_v9 = vpop.xlane.xlu0 %701 }
  0xb0   : > { %v705_v10 = vmul.f32 0.03125, %v702_v9  ;;  %v708_v11 = vmul.f32 %v706_v8, %v706_v8  ;;  %v3848_v9 = vmov 0  }
  0xb2   : > { %v707_v12 = vsub.f32 %v659_v3, %v705_v10  ;;  %v710_v13 = vsel %vm696_vm1, %v708_v11, 0.0 }
  0xb3   : > { %711 = vadd.xlane.f32.xlu1 %v710_v13 }
  0xb4   : > { %v709_v14 = vmul.f32 %v707_v12, %v707_v12 }
  0xb6   : > { %v713_v15 = vsel %vm696_vm1, %v709_v14, 0.0 }
  0xb7   : > { %714 = vadd.xlane.f32.xlu1 %v713_v15 }
 0x140   : > { %v712_v19 = vpop.xlane.xlu1 %711 }
 0x141   : > { %v716_v20 = vmul.f32 0.03125, %v712_v19 }
 0x143   : > { %v718_v21 = vadd.f32 1e-05, %v716_v20 }
 0x144   : > { %v715_v22 = vpop.xlane.xlu1 %714 }
 0x145   : > { %3770 = vrsqrt.f32 %v718_v21  ;;  %v717_v23 = vmul.f32 0.03125, %v715_v22 }
 0x147   : > { %v719_v24 = vadd.f32 1e-05, %v717_v23 }
 0x149   : > { %3772 = vrsqrt.f32 %v719_v24 }
 0x14f   : > { %v3771_v25 = vpop.eup %3770 }
 0x150   : > { %v722_v26 = vmul.f32 %v3771_v25, %v706_v8 }
 0x152   : > { %v730_v30 = vmul.f32 %v3461_v27, %v722_v26 }
 0x153   : > { %v3773_v28 = vpop.eup %3772 }
 0x154   : > { %v723_v29 = vmul.f32 %v3773_v28, %v707_v12  ;;  %v738_v33 = vadd.f32 %v3462_v31, %v730_v30 }
 0x156   : > { %v731_v32 = vmul.f32 %v3461_v27, %v723_v29 }
 0x158   : > { %v739_v34 = vadd.f32 %v3462_v31, %v731_v32 }
 0x15a   : > { %v740_v35 = vpack.c.bf16 %v739_v34, %v738_v33 }
 0x15c   : > { %3569 = vmatmul.mubr.msk.bf16.vlgmr.msra.gmra.mrb[0].mxu0 %vm696_vm1, %v740_v35 }
 0x15d   : > { %3574 = vmatprep.mubr.msk.bf16.mxu0 %vm3841_vm2, %v3840_v17 }
 0x22f   : > { %v796_v37 = vpop.f32.mrb[0].mxu0 }
 0x230   : > { %v797_v38 = vadd.f32 %v3463_v36, %v796_v37  ;;  %v3570_v39 = vpop.f32.mrb[1].mxu0 }
 0x231   : > { %v799_v40 = vpop.f32.mrb[2].mxu0 }
 0x232   : > { %v4047_v41 = vpack.c.bf16 %v797_v38, %v797_v38  ;;  %v800_v42 = vadd.f32 %v3463_v36, %v799_v40  ;;  %v3571_v43 = vpop.f32.mrb[3].mxu0 }
 0x234   : > { %811 = vrot.lane.b32.xlu1 %v4047_v41, %s3842_s15  ;;  %807 = vrot.lane.b32.xlu0 %v4047_v41, %s3843_s18  ;;  %v4051_v44 = vpack.c.bf16 %v800_v42, %v800_v42  ;;  %v825_v63 = vrot.slane %v4047_v41, %v4081_v56 }
 0x236   : > { %v892_v18 = vrot.slane %v4051_v44, %v4081_v56 }
 0x238   : > { %815 = vrot.lane.b32.xlu1 %v4047_v41, %s3844_s17  ;;  %813 = vrot.lane.b32.xlu0 %v4051_v44, %s3842_s15 }
 0x23c   : > { %1141 = vrot.lane.b32.xlu0 %v4047_v41, %s3845_s30  ;;  %809 = vrot.lane.b32.xlu1 %v4051_v44, %s3843_s18 }
 0x240   : > { %817 = vrot.lane.b32.xlu1 %v4051_v44, %s3844_s17 }
 0x2a6   : > { %v4058_v45 = vpop.permute.xlu1 %811  ;;  %v4060_v46 = vpop.permute.xlu0 %807 }
 0x2a7   : > { %1145 = vrot.lane.b32.xlu0 %v4058_v45, %s3845_s30  ;;  %1143 = vrot.lane.b32.xlu1 %v4060_v46, %s3845_s30  ;;  %v833_v61 = vrot.slane %v4058_v45, %v4081_v56  ;;  %v859_v62 = vrot.slane %v4060_v46, %v4081_v56 }
 0x2a9   : > { %v834_v3 = vcombine.low %v825_v63, %v833_v61  ;;  %v835_v4 = vcombine.high %v825_v63, %v833_v61 }
 0x2aa   : > { %v4064_v47 = vpop.permute.xlu1 %815  ;;  %v4068_v48 = vpop.permute.xlu0 %813 }
 0x2ab   : > { %1149 = vrot.lane.b32.xlu0 %v4051_v44, %s3845_s30  ;;  %1147 = vrot.lane.b32.xlu1 %v4064_v47, %s3845_s30  ;;  %v867_v59 = vrot.slane %v4064_v47, %v4081_v56  ;;  %v842_v7 = vrot.slane %v834_v3, %v4092_v2  ;;  %v849_v8 = vrot.slane %v835_v4, %v4092_v2 }
 0x2ac   : > { %v900_v14 = vrot.slane %v4068_v48, %v4081_v56 }
 0x2ad   : > { %v868_v0 = vcombine.low %v859_v62, %v867_v59  ;;  %v869_v1 = vcombine.high %v859_v62, %v867_v59  ;;  %v850_v12 = vcombine.high %v842_v7, %v3848_v9  ;;  %v851_v13 = vcombine.high %v849_v8, %v3848_v9 }
 0x2ae   : > { %v4070_v49 = vpop.permute.xlu1 %809  ;;  %v957_v23 = vshrl.u32 %v842_v7, 16  ;;  %v973_v24 = vshrl.u32 %v849_v8, 16  ;;  %v901_v25 = vcombine.low %v892_v18, %v900_v14  ;;  %v902_v26 = vcombine.high %v892_v18, %v900_v14  ;;  %v1142_v31 = vpop.permute.xlu0 %1141 }
 0x2af   : > { %1153 = vrot.lane.b32.xlu0 %v4068_v48, %s3845_s30  ;;  %1151 = vrot.lane.b32.xlu1 %v4070_v49, %s3845_s30  ;;  %v876_v5 = vrot.slane %v868_v0, %v4092_v2  ;;  %v883_v6 = vrot.slane %v869_v1, %v4092_v2  ;;  %v965_v19 = vshrl.u32 %v850_v12, 16  ;;  %v981_v20 = vshrl.u32 %v851_v13, 16 }
 0x2b0   : > { %v4109_v37 = vrot.slane %v901_v25, %v4092_v2  ;;  %v4112_v38 = vrot.slane %v902_v26, %v4092_v2  ;;  %v926_v39 = vrot.slane %v4070_v49, %v4081_v56  ;;  %v1164_v59 = vrot.slane %v1142_v31, %v4081_v56 }
 0x2b1   : > { %v884_v10 = vcombine.high %v876_v5, %v3848_v9  ;;  %v885_v11 = vcombine.high %v883_v6, %v3848_v9  ;;  %v958_v21 = vshrl.u32 %v876_v5, 16  ;;  %v974_v22 = vshrl.u32 %v883_v6, 16 }
 0x2b2   : > { %v4074_v50 = vpop.permute.xlu1 %817  ;;  %v955_v33 = vpack.i.b16 %v876_v5, %v842_v7  ;;  %v971_v35 = vpack.i.b16 %v883_v6, %v849_v8  ;;  %v4120_v61 = vcombine.high %v4109_v37, %v3848_v9  ;;  %v4124_v62 = vcombine.high %v4112_v38, %v3848_v9 }
 0x2b3   : > { %1155 = vrot.lane.b32.xlu1 %v4074_v50, %s3845_s30  ;;  %v966_v15 = vshrl.u32 %v884_v10, 16  ;;  %v982_v16 = vshrl.u32 %v885_v11, 16  ;;  %v963_v27 = vpack.i.b16 %v884_v10, %v850_v12  ;;  %v979_v29 = vpack.i.b16 %v885_v11, %v851_v13 }
 0x2b4   : > { %v934_v32 = vrot.slane %v4074_v50, %v4081_v56  ;;  %v959_v34 = vpack.i.b16 %v958_v21, %v957_v23  ;;  %v975_v36 = vpack.i.b16 %v974_v22, %v973_v24  ;;  %v1017_v57 = vcombine.low %v955_v33, %v971_v35 }
 0x2b5   : > { %v967_v28 = vpack.i.b16 %v966_v15, %v965_v19  ;;  %v983_v30 = vpack.i.b16 %v982_v16, %v981_v20  ;;  %v1025_v40 = vcombine.low %v963_v27, %v979_v29  ;;  %v989_v4 = vshrl.u32 %v4109_v37, 16 }
 0x2b6   : > { %v935_v43 = vcombine.low %v926_v39, %v934_v32  ;;  %v936_v51 = vcombine.high %v926_v39, %v934_v32  ;;  %v1042_v58 = vcombine.low %v959_v34, %v975_v36  ;;  %v1024_v8 = vrot.slane %v1017_v57, %v4081_v56 }
 0x2b7   : > { %v1050_v42 = vcombine.low %v967_v28, %v983_v30  ;;  %v1032_v63 = vrot.slane %v1025_v40, %v4081_v56  ;;  %v997_v14 = vshrl.u32 %v4120_v61, 16  ;;  %v1005_v15 = vshrl.u32 %v4112_v38, 16 }
 0x2b8   : > { %v4132_v5 = vrot.slane %v935_v43, %v4092_v2  ;;  %v4135_v6 = vrot.slane %v936_v51, %v4092_v2  ;;  %v4139_v10 = vrot.slane %v1042_v58, %v4081_v56  ;;  %v1013_v20 = vshrl.u32 %v4124_v62, 16 }
 0x2b9   : > { %v4128_v0 = vrot.slane %v1050_v42, %v4081_v56  ;;  %v4147_v19 = vcombine.low %v1024_v8, %v1032_v63 }
 0x2ba   : > { %v4155_v23 = vcombine.high %v4132_v5, %v3848_v9  ;;  %v4159_v24 = vcombine.high %v4135_v6, %v3848_v9  ;;  %v987_v28 = vpack.i.b16 %v4132_v5, %v4109_v37  ;;  %v990_v33 = vshrl.u32 %v4132_v5, 16 }
 0x2bb   : > { %v1058_v22 = vcombine.low %v4139_v10, %v4128_v0  ;;  %v1006_v34 = vshrl.u32 %v4135_v6, 16 }
 0x2bc   : > { %v998_v53 = vshrl.u32 %v4155_v23, 16 }
 0x319   : > { %v1146_v52 = vpop.permute.xlu0 %1145  ;;  %v1144_v54 = vpop.permute.xlu1 %1143 }
 0x31a   : > { %v1172_v60 = vrot.slane %v1146_v52, %v4081_v56  ;;  %v1198_v16 = vrot.slane %v1144_v54, %v4081_v56 }
 0x31c   : > { %v1173_v1 = vcombine.low %v1164_v59, %v1172_v60  ;;  %v1174_v3 = vcombine.high %v1164_v59, %v1172_v60 }
 0x31d   : > { %v1150_v7 = vpop.permute.xlu0 %1149  ;;  %v1148_v13 = vpop.permute.xlu1 %1147 }
 0x31e   : > { %v1181_v11 = vrot.slane %v1173_v1, %v4092_v2  ;;  %v1188_v12 = vrot.slane %v1174_v3, %v4092_v2  ;;  %v1206_v18 = vrot.slane %v1148_v13, %v4081_v56  ;;  %v1232_v30 = vrot.slane %v1150_v7, %v4081_v56 }
 0x320   : > { %v1189_v21 = vcombine.high %v1181_v11, %v3848_v9  ;;  %v1207_v25 = vcombine.low %v1198_v16, %v1206_v18  ;;  %v1208_v26 = vcombine.high %v1198_v16, %v1206_v18  ;;  %v1190_v29 = vcombine.high %v1188_v12, %v3848_v9 }
 0x321   : > { %v1154_v27 = vpop.permute.xlu0 %1153  ;;  %v1152_v32 = vpop.permute.xlu1 %1151  ;;  %v1297_v39 = vshrl.u32 %v1181_v11, 16  ;;  %v1313_v42 = vshrl.u32 %v1188_v12, 16 }
 0x322   : > { %v1240_v31 = vrot.slane %v1154_v27, %v4081_v56  ;;  %v1215_v35 = vrot.slane %v1207_v25, %v4092_v2  ;;  %v1222_v36 = vrot.slane %v1208_v26, %v4092_v2  ;;  %v1305_v40 = vshrl.u32 %v1189_v21, 16 }
 0x323   : > { %v1321_v58 = vshrl.u32 %v1190_v29, 16  ;;  %v4173_v27 = vpack.i.b16 %v990_v33, %v989_v4  ;;  %v995_v4 = vpack.i.b16 %v4155_v23, %v4120_v61  ;;  %v1011_v33 = vpack.i.b16 %v4159_v24, %v4124_v62 }
 0x324   : > { %v1241_v43 = vcombine.low %v1232_v30, %v1240_v31  ;;  %v1223_v51 = vcombine.high %v1215_v35, %v3848_v9  ;;  %v1224_v52 = vcombine.high %v1222_v36, %v3848_v9  ;;  %v1295_v54 = vpack.i.b16 %v1215_v35, %v1181_v11 }
 0x325   : > { %v1298_v57 = vshrl.u32 %v1215_v35, 16  ;;  %v1311_v59 = vpack.i.b16 %v1222_v36, %v1188_v12  ;;  %v1314_v60 = vshrl.u32 %v1222_v36, 16  ;;  %v1242_v63 = vcombine.high %v1232_v30, %v1240_v31  ;;  %v1156_v26 = vpop.permute.xlu1 %1155 }
 0x326   : > { %v1303_v3 = vpack.i.b16 %v1223_v51, %v1189_v21  ;;  %v1306_v7 = vshrl.u32 %v1223_v51, 16  ;;  %v1319_v8 = vpack.i.b16 %v1224_v52, %v1190_v29  ;;  %v1322_v16 = vshrl.u32 %v1224_v52, 16 }
 0x327   : > { %v1299_v1 = vpack.i.b16 %v1298_v57, %v1297_v39  ;;  %v1315_v13 = vpack.i.b16 %v1314_v60, %v1313_v42  ;;  %v1357_v18 = vcombine.low %v1295_v54, %v1311_v59  ;;  %v1249_v25 = vrot.slane %v1241_v43, %v4092_v2 }
 0x328   : > { %v1307_v11 = vpack.i.b16 %v1306_v7, %v1305_v40  ;;  %v1365_v35 = vcombine.low %v1303_v3, %v1319_v8  ;;  %v1014_v12 = vshrl.u32 %v4159_v24, 16  ;;  %v1323_v36 = vpack.i.b16 %v1322_v16, %v1321_v58 }
 0x329   : > { %v1382_v30 = vcombine.low %v1299_v1, %v1315_v13  ;;  %v1256_v21 = vrot.slane %v1242_v63, %v4092_v2  ;;  %v1364_v29 = vrot.slane %v1357_v18, %v4081_v56  ;;  %v1266_v31 = vrot.slane %v1152_v32, %v4081_v56 }
 0x32a   : > { %v1274_v39 = vrot.slane %v1156_v26, %v4081_v56  ;;  %v1372_v42 = vrot.slane %v1365_v35, %v4081_v56  ;;  %v1390_v40 = vcombine.low %v1307_v11, %v1323_v36  ;;  %v1257_v43 = vcombine.high %v1249_v25, %v3848_v9 }
 0x32b   : > { %v4187_v51 = vpack.i.b16 %v1006_v34, %v1005_v15  ;;  %v999_v32 = vpack.i.b16 %v998_v53, %v997_v14  ;;  %v1258_v58 = vcombine.high %v1256_v21, %v3848_v9  ;;  %v1389_v59 = vrot.slane %v1382_v30, %v4081_v56 }
 0x32c   : > { %v1275_v52 = vcombine.low %v1266_v31, %v1274_v39  ;;  %v1276_v54 = vcombine.high %v1266_v31, %v1274_v39  ;;  %v1373_v57 = vcombine.low %v1364_v29, %v1372_v42  ;;  %v1397_v23 = vrot.slane %v1390_v40, %v4081_v56 }
 0x32d   : > { %v1015_v24 = vpack.i.b16 %v1014_v12, %v1013_v20  ;;  %v1329_v60 = vshrl.u32 %v1249_v25, 16  ;;  %v1337_v34 = vshrl.u32 %v1257_v43, 16  ;;  %v1345_v1 = vshrl.u32 %v1256_v21, 16 }
 0x32e   : > { %v1283_v63 = vrot.slane %v1275_v52, %v4092_v2  ;;  %v1290_v15 = vrot.slane %v1276_v54, %v4092_v2  ;;  %v1380_v3 = vrot.slane %v1373_v57, %v4092_v2  ;;  %v1398_v61 = vcombine.low %v1389_v59, %v1397_v23 }
 0x32f   : > { %v1353_v13 = vshrl.u32 %v1258_v58, 16 }
 0x330   : > { %v1291_v53 = vcombine.high %v1283_v63, %v3848_v9  ;;  %v1292_v14 = vcombine.high %v1290_v15, %v3848_v9  ;;  %v1327_v7 = vpack.i.b16 %v1283_v63, %v1249_v25  ;;  %v1330_v8 = vshrl.u32 %v1283_v63, 16 }
 0x331   : > { %v1343_v16 = vpack.i.b16 %v1290_v15, %v1256_v21  ;;  %v1346_v62 = vshrl.u32 %v1290_v15, 16  ;;  %v1405_v20 = vrot.slane %v1398_v61, %v4092_v2  ;;  %v1381_v42 = vcombine.high %v1380_v3, %v3848_v9 }
 0x332   : > { %v1331_v18 = vpack.i.b16 %v1330_v8, %v1329_v60  ;;  %v1335_v26 = vpack.i.b16 %v1291_v53, %v1257_v43  ;;  %v1338_v11 = vshrl.u32 %v1291_v53, 16  ;;  %v1351_v35 = vpack.i.b16 %v1292_v14, %v1258_v58 }
 0x333   : > { %v1347_v12 = vpack.i.b16 %v1346_v62, %v1345_v1  ;;  %v1354_v36 = vshrl.u32 %v1292_v14, 16  ;;  %v1407_v30 = vcombine.low %v1327_v7, %v1343_v16  ;;  %v1459_v29 = vpack.i.b16 %v1405_v20, %v1380_v3 }
 0x334   : > { %v1339_v31 = vpack.i.b16 %v1338_v11, %v1337_v34  ;;  %v1415_v39 = vcombine.low %v1335_v26, %v1351_v35  ;;  %v1406_v25 = vcombine.high %v1405_v20, %v3848_v9  ;;  %v1003_v21 = vpack.i.b16 %v4135_v6, %v4112_v38 }
 0x335   : > { %v1355_v40 = vpack.i.b16 %v1354_v36, %v1353_v13  ;;  %v1432_v52 = vcombine.low %v1331_v18, %v1347_v12  ;;  %v1826_v54 = vsel %vm1821_vm3, %v1459_v29, 0  ;;  %v1100_v43 = vcombine.low %v999_v32, %v1015_v24 }
 0x336   : > { %3573 = vmatpush3.bf16.xpose.msra.mxu0 %v1826_v54  ;;  %v1465_v57 = vpack.i.b16 %v1406_v25, %v1381_v42  ;;  %v1065_v58 = vrot.slane %v1058_v22, %v4092_v2  ;;  %v1461_v59 = vshrl.u32 %v1405_v20, 16  ;;  %v1414_v23 = vrot.slane %v1407_v30, %v4081_v56 }
 0x337   : > { %v1440_v60 = vcombine.low %v1339_v31, %v1355_v40  ;;  %3578 = vmatprep.subr.bf16.mxu0 %v3840_v17  ;;  %v1460_v63 = vshrl.u32 %v1380_v3, 16  ;;  %v1422_v38 = vrot.slane %v1415_v39, %v4081_v56  ;;  %v1075_v6 = vcombine.low %v995_v4, %v1011_v33 }
 0x338   : > { %v1092_v32 = vcombine.low %v4173_v27, %v4187_v51  ;;  %v1918_v24 = vsel %vm1821_vm3, %v1465_v57, 0  ;;  %v1040_v15 = vrot.slane %v4147_v19, %v4092_v2  ;;  %v1439_v22 = vrot.slane %v1432_v52, %v4081_v56 }
 0x339   : > { %3585 = vmatpush3.bf16.xpose.msra.mxu1 %v1918_v24  ;;  %v1462_v0 = vpack.i.b16 %v1461_v59, %v1460_v63  ;;  %v1423_v10 = vcombine.low %v1414_v23, %v1422_v38  ;;  %v1447_v34 = vrot.slane %v1440_v60, %v4081_v56  ;;  %v1067_v1 = vcombine.low %v987_v28, %v1003_v21 }
 0x33a   : > { %v1066_v4 = vcombine.high %v1065_v58, %v3848_v9  ;;  %3596 = vmatprep.subr.bf16.mxu1 %v3840_v17  ;;  %v1107_v27 = vrot.slane %v1100_v43, %v4081_v56  ;;  %v1119_v33 = vpack.i.b16 %v1065_v58, %v1040_v15  ;;  %v1082_v19 = vrot.slane %v1075_v6, %v4081_v56 }
 0x33b   : > { %v1448_v51 = vcombine.low %v1439_v22, %v1447_v34  ;;  %v1099_v3 = vrot.slane %v1092_v32, %v4081_v56  ;;  %v1041_v61 = vcombine.high %v1040_v15, %v3848_v9  ;;  %v1467_v53 = vshrl.u32 %v1406_v25, 16 }
 0x33c   : > { %v1872_v37 = vsel %vm1821_vm3, %v1462_v0, 0  ;;  %v1430_v5 = vrot.slane %v1423_v10, %v4092_v2  ;;  %v1074_v14 = vrot.slane %v1067_v1, %v4081_v56  ;;  %v1466_v8 = vshrl.u32 %v1381_v42, 16 }
 0x33d   : > { %3575 = vmatmul.mubr.msk.bf16.vlgmr.msra.gmra.mrb[4].mxu0 %vm1821_vm3, %v1119_v33  ;;  %v1455_v28 = vrot.slane %v1448_v51, %v4092_v2  ;;  %v1125_v7 = vpack.i.b16 %v1066_v4, %v1041_v61  ;;  %v1121_v16 = vshrl.u32 %v1065_v58, 16  ;;  %v1108_v62 = vcombine.low %v1099_v3, %v1107_v27 }
 0x33e   : > { %3579 = vmatpush3.bf16.xpose.msra.mxu0 %v1872_v37  ;;  %3580 = vmatprep.mubr.msk.bf16.mxu0 %vm3841_vm2, %v3840_v17  ;;  %v1120_v20 = vshrl.u32 %v1040_v15, 16  ;;  %v1083_v18 = vcombine.low %v1074_v14, %v1082_v19  ;;  %v1468_v11 = vpack.i.b16 %v1467_v53, %v1466_v8  ;;  %v1431_v30 = vcombine.high %v1430_v5, %v3848_v9 }
 0x33f   : > { %v1471_v13 = vpack.i.b16 %v1455_v28, %v1430_v5  ;;  %3590 = vmatprep.subr.bf16.mxu0 %v3840_v17  ;;  %v1456_v35 = vcombine.high %v1455_v28, %v3848_v9  ;;  %v1115_v36 = vrot.slane %v1108_v62, %v4092_v2  ;;  %v1473_v42 = vshrl.u32 %v1455_v28, 16 }
 0x340   : > { %3587 = vmatmul.mubr.msk.bf16.vlgmr.msra.gmra.mrb[0].mxu1 %vm1821_vm3, %v1125_v7  ;;  %v1122_v12 = vpack.i.b16 %v1121_v16, %v1120_v20  ;;  %v1964_v29 = vsel %vm1821_vm3, %v1468_v11, 0  ;;  %v1090_v31 = vrot.slane %v1083_v18, %v4092_v2  ;;  %v1127_v25 = vshrl.u32 %v1066_v4, 16 }
 0x341   : > { %v2010_v26 = vsel %vm1821_vm3, %v1471_v13, 0  ;;  %3598 = vmatprep.mubr.msk.bf16.mxu1 %vm3841_vm2, %v3840_v17  ;;  %v1477_v39 = vpack.i.b16 %v1456_v35, %v1431_v30  ;;  %v1472_v40 = vshrl.u32 %v1430_v5, 16  ;;  %v1126_v52 = vshrl.u32 %v1041_v61, 16 }
 0x342   : > { %3597 = vmatpush3.bf16.xpose.msra.mxu1 %v2010_v26  ;;  %v1131_v21 = vpack.i.b16 %v1115_v36, %v1090_v31  ;;  %v1116_v58 = vcombine.high %v1115_v36, %v3848_v9  ;;  %v1091_v23 = vcombine.high %v1090_v31, %v3848_v9  ;;  %v1479_v60 = vshrl.u32 %v1456_v35, 16 }
 0x343   : > { %3608 = vmatprep.subr.bf16.mxu1 %v3840_v17  ;;  %v2102_v54 = vsel %vm1821_vm3, %v1477_v39, 0  ;;  %v1474_v43 = vpack.i.b16 %v1473_v42, %v1472_v40  ;;  %v1128_v57 = vpack.i.b16 %v1127_v25, %v1126_v52  ;;  %v1133_v38 = vshrl.u32 %v1115_v36, 16 }
 0x344   : > { %v1137_v63 = vpack.i.b16 %v1116_v58, %v1091_v23  ;;  %v1478_v6 = vshrl.u32 %v1431_v30, 16  ;;  %v1132_v32 = vshrl.u32 %v1090_v31, 16  ;;  %v1139_v10 = vshrl.u32 %v1116_v58, 16 }
 0x345   : > { %3581 = vmatmul.mubr.msk.bf16.vlgmr.msra.gmra.mrb[8].mxu0 %vm1821_vm3, %v1122_v12  ;;  %v2056_v59 = vsel %vm1821_vm3, %v1474_v43, 0  ;;  %v1138_v22 = vshrl.u32 %v1091_v23, 16  ;;  %v4629_v1 = vlaneseq }
 0x346   : > { %3591 = vmatpush3.bf16.xpose.msra.mxu0 %v1964_v29  ;;  %3592 = vmatprep.mubr.msk.bf16.mxu0 %vm3841_vm2, %v3840_v17  ;;  %v1480_v24 = vpack.i.b16 %v1479_v60, %v1478_v6  ;;  %v1134_v15 = vpack.i.b16 %v1133_v38, %v1132_v32 }
 0x347   : > { %3602 = vmatprep.subr.bf16.mxu0 %v3840_v17  ;;  %v1140_v34 = vpack.i.b16 %v1139_v10, %v1138_v22  ;;  %v2193_v4 = vand.u32 127, %v4629_v1 }
 0x348   : > { %v2148_v0 = vsel %vm1821_vm3, %v1480_v24, 0 }
 0x349   : > { %3599 = vmatmul.mubr.msk.bf16.vlgmr.msra.gmra.mrb[4].mxu1 %vm1821_vm3, %v1131_v21  ;;  %vm4277_vm4 = vcmp.ge.s32.totalorder %v4078_v55, %v2193_v4 }
 0x34a   : > { %3609 = vmatpush3.bf16.xpose.msra.mxu1 %v2102_v54  ;;  %3610 = vmatprep.mubr.msk.bf16.mxu1 %vm3841_vm2, %v3840_v17 }
 0x34b   : > { %3620 = vmatprep.subr.bf16.mxu1 %v3840_v17 }
 0x34d   : > { %3593 = vmatmul.mubr.msk.bf16.vlgmr.msra.gmra.mrb[12].mxu0 %vm1821_vm3, %v1128_v57 }
 0x34e   : > { %3603 = vmatpush3.bf16.xpose.msra.mxu0 %v2056_v59  ;;  %3604 = vmatprep.mubr.msk.bf16.mxu0 %vm3841_vm2, %v3840_v17 }
 0x34f   : > { %3614 = vmatprep.subr.bf16.mxu0 %v3840_v17 }
 0x351   : > { %3611 = vmatmul.mubr.msk.bf16.vlgmr.msra.gmra.mrb[8].mxu1 %vm1821_vm3, %v1137_v63 }
 0x352   : > { %3622 = vmatprep.mubr.msk.bf16.mxu1 %vm3841_vm2, %v3840_v17 }
 0x355   : > { %3605 = vmatmul.mubr.msk.bf16.vlgmr.msra.gmra.mrb[16].mxu0 %vm1821_vm3, %v1134_v15 }
 0x356   : > { %3615 = vmatpush3.bf16.xpose.msra.mxu0 %v2148_v0  ;;  %3616 = vmatprep.mubr.msk.bf16.mxu0 %vm3841_vm2, %v3840_v17 }
 0x357   : > { %3626 = vmatprep.subr.bf16.mxu0 %v3840_v17 }
 0x35d   : > { %3617 = vmatmul.mubr.msk.bf16.vlgmr.msra.gmra.mrb[20].mxu0 %vm1821_vm3, %v1140_v34 }
 0x35e   : > { %3628 = vmatprep.mubr.msk.bf16.mxu0 %vm3841_vm2, %v3840_v17 }
 0x410   : > { %v1862_v33 = vpop.f32.mrb[4].mxu0 }
 0x411   : > { %v2197_v51 = vsel %vm4277_vm4, %v1862_v33, -1e+30  ;;  %v3576_v19 = vpop.f32.mrb[5].mxu0 }
 0x412   : > { %v1865_v3 = vpop.f32.mrb[6].mxu0  ;;  %v2205_v61 = vsel %vm1821_vm3, %v2197_v51, -inf }
 0x413   : > { %v1954_v53 = vpop.f32.mrb[0].mxu1  ;;  %2206 = vmax.xlane.f32.xlu0 %v2205_v61  ;;  %v3577_v37 = vpop.f32.mrb[7].mxu0 }
 0x414   : > { %v2199_v5 = vsel %vm4277_vm4, %v1954_v53, -1e+30  ;;  %v3588_v28 = vpop.f32.mrb[1].mxu1 }
 0x415   : > { %v1957_v14 = vpop.f32.mrb[2].mxu1  ;;  %v2211_v7 = vsel %vm1821_vm3, %v2199_v5, -inf }
 0x416   : > { %v3589_v55 = vpop.f32.mrb[3].mxu1 }
 0x417   : > { %2212 = vmax.xlane.f32.xlu0 %v2211_v7 }
 0x418   : > { %v1908_v8 = vpop.f32.mrb[8].mxu0 }
 0x419   : > { %v2198_v13 = vsel %vm4277_vm4, %v1908_v8, -1e+30  ;;  %v3582_v16 = vpop.f32.mrb[9].mxu0 }
 0x41a   : > { %v1911_v62 = vpop.f32.mrb[10].mxu0  ;;  %v2208_v20 = vsel %vm1821_vm3, %v2198_v13, -inf }
 0x41b   : > { %2209 = vmax.xlane.f32.xlu1 %v2208_v20  ;;  %v3583_v18 = vpop.f32.mrb[11].mxu0 }
 0x41c   : > { %v2046_v26 = vpop.f32.mrb[4].mxu1 }
 0x41d   : > { %v2201_v11 = vsel %vm4277_vm4, %v2046_v26, -1e+30  ;;  %v3600_v35 = vpop.f32.mrb[5].mxu1 }
 0x41e   : > { %v2049_v12 = vpop.f32.mrb[6].mxu1  ;;  %v2217_v36 = vsel %vm1821_vm3, %v2201_v11, -inf }
 0x41f   : > { %v3601_v30 = vpop.f32.mrb[7].mxu1  ;;  %2218 = vmax.xlane.f32.xlu0 %v2217_v36 }
 0x420   : > { %v2000_v29 = vpop.f32.mrb[12].mxu0 }
 0x421   : > { %v2200_v31 = vsel %vm4277_vm4, %v2000_v29, -1e+30  ;;  %v3594_v39 = vpop.f32.mrb[13].mxu0 }
 0x422   : > { %v2003_v42 = vpop.f32.mrb[14].mxu0  ;;  %v2214_v25 = vsel %vm1821_vm3, %v2200_v31, -inf }
 0x423   : > { %2215 = vmax.xlane.f32.xlu0 %v2214_v25  ;;  %v3595_v21 = vpop.f32.mrb[15].mxu0 }
 0x424   : > { %v2138_v40 = vpop.f32.mrb[8].mxu1 }
 0x425   : > { %v4298_v52 = vsel %vm4277_vm4, %v2138_v40, -1e+30  ;;  %v3612_v54 = vpop.f32.mrb[9].mxu1 }
 0x426   : > { %v2141_v43 = vpop.f32.mrb[10].mxu1  ;;  %v2223_v57 = vsel %vm1821_vm3, %v4298_v52, -inf }
 0x427   : > { %v3613_v58 = vpop.f32.mrb[11].mxu1  ;;  %2224 = vmax.xlane.f32.xlu0 %v2223_v57 }
 0x428   : > { %v2092_v59 = vpop.f32.mrb[16].mxu0 }
 0x429   : > { %v4304_v23 = vsel %vm4277_vm4, %v2092_v59, -1e+30  ;;  %v3606_v60 = vpop.f32.mrb[17].mxu0 }
 0x42a   : > { %v2095_v63 = vpop.f32.mrb[18].mxu0  ;;  %v2220_v10 = vsel %vm1821_vm3, %v4304_v23, -inf }
 0x42b   : > { %v3607_v38 = vpop.f32.mrb[19].mxu0 }
 0x42c   : > { %1483 = vrot.lane.b32.xlu1 %v4060_v46, %s3849_s21 }
 0x430   : > { %1485 = vrot.lane.b32.xlu1 %v4058_v45, %s3849_s21  ;;  %v2184_v6 = vpop.f32.mrb[20].mxu0 }
 0x431   : > { %v4312_v32 = vsel %vm4277_vm4, %v2184_v6, -1e+30  ;;  %v3618_v24 = vpop.f32.mrb[21].mxu0 }
 0x432   : > { %v2187_v15 = vpop.f32.mrb[22].mxu0  ;;  %v2226_v46 = vsel %vm1821_vm3, %v4312_v32, -inf }
 0x433   : > { %v3619_v0 = vpop.f32.mrb[23].mxu0 }
 0x43d   : > { %1481 = vrot.lane.b32.xlu0 %v4047_v41, %s3849_s21 }
 0x454   : > { %2221 = vmax.xlane.f32.xlu1 %v2220_v10 }
 0x458   : > { %2227 = vmax.xlane.f32.xlu1 %v2226_v46 }
 0x469   : > { %1487 = vrot.lane.b32.xlu1 %v4064_v47, %s3849_s21 }
 0x4a0   : > { %v2207_v45 = vpop.xlane.xlu0 %2206 }
 0x4a1   : > { %v2229_v22 = vsub.f32 %v2197_v51, %v2207_v45 }
 0x4a3   : > { %v2237_v34 = vmul.f32 1.442695, %v2229_v22 }
 0x4a4   : > { %v2213_v1 = vpop.xlane.xlu0 %2212 }
 0x4a5   : > { %3774 = vpow2.f32 %v2237_v34  ;;  %v2231_v4 = vsub.f32 %v2199_v5, %v2213_v1 }
 0x4a7   : > { %v2241_v27 = vmul.f32 1.442695, %v2231_v4 }
 0x4a8   : > { %v2210_v33 = vpop.xlane.xlu1 %2209 }
 0x4a9   : > { %3776 = vpow2.f32 %v2241_v27  ;;  %v2230_v41 = vsub.f32 %v2198_v13, %v2210_v33 }
 0x4ab   : > { %v2239_v19 = vmul.f32 1.442695, %v2230_v41 }
 0x4ac   : > { %v2219_v3 = vpop.xlane.xlu0 %2218  ;;  %v1484_v18 = vpop.permute.xlu1 %1483 }
 0x4ad   : > { %3778 = vpow2.f32 %v2239_v19  ;;  %v2233_v61 = vsub.f32 %v2201_v11, %v2219_v3 }
 0x4af   : > { %v4322_v53 = vpop.eup %3774  ;;  %v2245_v37 = vmul.f32 1.442695, %v2233_v61 }
 0x4b0   : > { %v2216_v28 = vpop.xlane.xlu0 %2215  ;;  %v2253_v47 = vsel %vm1821_vm3, %v4322_v53, 0.0  ;;  %v1486_v11 = vpop.permute.xlu1 %1485 }
 0x4b1   : > { %3780 = vpow2.f32 %v2245_v37  ;;  %v2232_v51 = vsub.f32 %v2200_v31, %v2216_v28  ;;  %2254 = vadd.xlane.f32.xlu0 %v2253_v47  ;;  %v1512_v29 = vrot.slane %v1486_v11, %v4081_v56 }
 0x4b3   : > { %v4326_v14 = vpop.eup %3776  ;;  %v2243_v5 = vmul.f32 1.442695, %v2232_v51 }
 0x4b4   : > { %v2259_v55 = vsel %vm1821_vm3, %v4326_v14, 0.0  ;;  %v4346_v26 = vpop.xlane.xlu0 %2224 }
 0x4b5   : > { %3782 = vpow2.f32 %v2243_v5  ;;  %2260 = vadd.xlane.f32.xlu0 %v2259_v55 }
 0x4b7   : > { %v4330_v7 = vpop.eup %3778 }
 0x4b8   : > { %v2256_v8 = vsel %vm1821_vm3, %v4330_v7, 0.0  ;;  %v1482_v35 = vpop.permute.xlu0 %1481 }
 0x4b9   : > { %2257 = vadd.xlane.f32.xlu1 %v2256_v8  ;;  %v1504_v12 = vrot.slane %v1482_v35, %v4081_v56 }
 0x4bb   : > { %v4334_v13 = vpop.eup %3780 }
 0x4bc   : > { %v2265_v16 = vsel %vm1821_vm3, %v4334_v13, 0.0 }
 0x4bd   : > { %2266 = vadd.xlane.f32.xlu0 %v2265_v16 }
 0x4bf   : > { %v4338_v62 = vpop.eup %3782 }
 0x4c0   : > { %v2262_v20 = vsel %vm1821_vm3, %v4338_v62, 0.0 }
 0x4c1   : > { %2263 = vadd.xlane.f32.xlu1 %v2262_v20 }
 0x4d2   : > { %1491 = vrot.lane.b32.xlu1 %v4070_v49, %s3849_s21  ;;  %v1513_v49 = vcombine.low %v1504_v12, %v1512_v29 }
 0x4d4   : > { %v1521_v25 = vrot.slane %v1513_v49, %v4092_v2 }
 0x4d6   : > { %1493 = vrot.lane.b32.xlu1 %v4068_v48, %s3849_s21  ;;  %v1514_v48 = vcombine.high %v1504_v12, %v1512_v29  ;;  %v1529_v59 = vcombine.high %v1521_v25, %v3848_v9  ;;  %v1637_v38 = vshrl.u32 %v1521_v25, 16 }
 0x4d8   : > { %v1528_v54 = vrot.slane %v1514_v48, %v4092_v2  ;;  %v1645_v46 = vshrl.u32 %v1529_v59, 16 }
 0x4da   : > { %1495 = vrot.lane.b32.xlu1 %v4074_v50, %s3849_s21  ;;  %v1538_v50 = vrot.slane %v1484_v18, %v4081_v56  ;;  %v1530_v63 = vcombine.high %v1528_v54, %v3848_v9  ;;  %v1653_v6 = vshrl.u32 %v1528_v54, 16 }
 0x4dc   : > { %v1661_v41 = vshrl.u32 %v1530_v63, 16 }
 0x4e1   : > { %v2222_v36 = vpop.xlane.xlu1 %2221 }
 0x4e2   : > { %v2234_v30 = vsub.f32 %v4304_v23, %v2222_v36 }
 0x4e4   : > { %v2247_v31 = vmul.f32 1.442695, %v2234_v30 }
 0x4e5   : > { %v2228_v39 = vpop.xlane.xlu1 %2227 }
 0x4e6   : > { %3784 = vpow2.f32 %v2247_v31  ;;  %v2236_v42 = vsub.f32 %v4312_v32, %v2228_v39 }
 0x4e8   : > { %v2251_v43 = vmul.f32 1.442695, %v2236_v42 }
 0x4e9   : > { %v1488_v21 = vpop.permute.xlu1 %1487 }
 0x4ea   : > { %v1546_v40 = vrot.slane %v1488_v21, %v4081_v56  ;;  %3786 = vpow2.f32 %v2251_v43 }
 0x4ec   : > { %v1547_v57 = vcombine.low %v1538_v50, %v1546_v40  ;;  %v1548_v58 = vcombine.high %v1538_v50, %v1546_v40 }
 0x4ee   : > { %v1555_v23 = vrot.slane %v1547_v57, %v4092_v2  ;;  %v1562_v60 = vrot.slane %v1548_v58, %v4092_v2  ;;  %v2235_v57 = vsub.f32 %v4298_v52, %v4346_v26 }
 0x4f0   : > { %v4362_v32 = vpop.eup %3784  ;;  %v1563_v24 = vcombine.high %v1555_v23, %v3848_v9  ;;  %v1564_v15 = vcombine.high %v1562_v60, %v3848_v9  ;;  %v1635_v0 = vpack.i.b16 %v1555_v23, %v1521_v25  ;;  %v1638_v10 = vshrl.u32 %v1555_v23, 16 }
 0x4f1   : > { %v1651_v45 = vpack.i.b16 %v1562_v60, %v1528_v54  ;;  %v1654_v22 = vshrl.u32 %v1562_v60, 16  ;;  %v2268_v34 = vsel %vm1821_vm3, %v4362_v32, 0.0  ;;  %v2249_v58 = vmul.f32 1.442695, %v2235_v57 }
 0x4f2   : > { %v1639_v1 = vpack.i.b16 %v1638_v10, %v1637_v38  ;;  %v1643_v4 = vpack.i.b16 %v1563_v24, %v1529_v59  ;;  %v1646_v27 = vshrl.u32 %v1563_v24, 16  ;;  %v1659_v33 = vpack.i.b16 %v1564_v15, %v1530_v63  ;;  %2269 = vadd.xlane.f32.xlu0 %v2268_v34 }
 0x4f3   : > { %v1655_v19 = vpack.i.b16 %v1654_v22, %v1653_v6  ;;  %v1662_v3 = vshrl.u32 %v1564_v15, 16  ;;  %v1697_v61 = vcombine.low %v1635_v0, %v1651_v45  ;;  %3788 = vpow2.f32 %v2249_v58 }
 0x4f4   : > { %v1647_v37 = vpack.i.b16 %v1646_v27, %v1645_v46  ;;  %v1705_v28 = vcombine.low %v1643_v4, %v1659_v33  ;;  %v4370_v20 = vpop.eup %3786 }
 0x4f5   : > { %v1663_v47 = vpack.i.b16 %v1662_v3, %v1661_v41  ;;  %v1722_v51 = vcombine.low %v1639_v1, %v1655_v19  ;;  %v1704_v5 = vrot.slane %v1697_v61, %v4081_v56  ;;  %v2274_v30 = vsel %vm1821_vm3, %v4370_v20, 0.0 }
 0x4f6   : > { %v1712_v55 = vrot.slane %v1705_v28, %v4081_v56 }
 0x4f7   : > { %v1730_v8 = vcombine.low %v1647_v37, %v1663_v47  ;;  %v1729_v18 = vrot.slane %v1722_v51, %v4081_v56 }
 0x4f8   : > { %v1713_v16 = vcombine.low %v1704_v5, %v1712_v55 }
 0x4f9   : > { %v1737_v11 = vrot.slane %v1730_v8, %v4081_v56 }
 0x4fa   : > { %v1720_v35 = vrot.slane %v1713_v16, %v4092_v2 }
 0x4fb   : > { %v1738_v12 = vcombine.low %v1729_v18, %v1737_v11 }
 0x4fc   : > { %v1721_v36 = vcombine.high %v1720_v35, %v3848_v9  ;;  %v1800_v49 = vshrl.u32 %v1720_v35, 16 }
 0x4fd   : > { %v1745_v29 = vrot.slane %v1738_v12, %v4092_v2  ;;  %v4388_v59 = vpop.eup %3788 }
 0x4fe   : > { %2275 = vadd.xlane.f32.xlu1 %v2274_v30  ;;  %v1806_v42 = vshrl.u32 %v1721_v36, 16  ;;  %v2271_v23 = vsel %vm1821_vm3, %v4388_v59, 0.0 }
 0x4ff   : > { %v1799_v31 = vpack.i.b16 %v1745_v29, %v1720_v35  ;;  %v1801_v39 = vshrl.u32 %v1745_v29, 16  ;;  %v1746_v48 = vcombine.high %v1745_v29, %v3848_v9 }
 0x501   : > { %v2306_v25 = vsel %vm2304_vm5, %v1799_v31, 0  ;;  %v1802_v21 = vpack.i.b16 %v1801_v39, %v1800_v49  ;;  %v1805_v50 = vpack.i.b16 %v1746_v48, %v1721_v36  ;;  %v1807_v40 = vshrl.u32 %v1746_v48, 16 }
 0x502   : > { %3621 = vmatpush3.bf16.msra.mxu1 %v2306_v25 }
 0x503   : > { %v2352_v54 = vsel %vm2304_vm5, %v1802_v21, 0  ;;  %3632 = vmatprep.subr.bf16.mxu1 %v3840_v17  ;;  %v1808_v43 = vpack.i.b16 %v1807_v40, %v1806_v42  ;;  %v2398_v52 = vsel %vm2304_vm5, %v1805_v50, 0 }
 0x504   : > { %3627 = vmatpush3.bf16.msra.mxu0 %v2352_v54 }
 0x505   : > { %3638 = vmatprep.subr.bf16.mxu0 %v3840_v17  ;;  %v2444_v22 = vsel %vm2304_vm5, %v1808_v43, 0 }
 0x508   : > { %1489 = vrot.lane.b32.xlu0 %v4051_v44, %s3849_s21 }
 0x527   : > { %2272 = vadd.xlane.f32.xlu0 %v2271_v23 }
 0x53e   : > { %v2255_v60 = vpop.xlane.xlu0 %2254 }
 0x53f   : > { %3790 = vrcp.f32 %v2255_v60 }
 0x542   : > { %v2261_v63 = vpop.xlane.xlu0 %2260 }
 0x543   : > { %3792 = vrcp.f32 %v2261_v63 }
 0x546   : > { %v2258_v38 = vpop.xlane.xlu1 %2257 }
 0x547   : > { %3794 = vrcp.f32 %v2258_v38 }
 0x549   : > { %v3791_v6 = vpop.eup %3790 }
 0x54a   : > { %v2285_v44 = vmul.f32 %v3791_v6, %v4322_v53  ;;  %v2267_v33 = vpop.xlane.xlu0 %2266 }
 0x54c   : > { %v2293_v24 = vpack.c.bf16 %v2285_v44, %v2285_v44 }
 0x54d   : > { %v3793_v15 = vpop.eup %3792 }
 0x54e   : > { %3623 = vmatmul.mubr.msk.bf16.vlgmr.msra.gmra.mrb[12].mxu1 %vm1821_vm3, %v2293_v24  ;;  %v2264_v26 = vpop.xlane.xlu1 %2263  ;;  %v2287_v0 = vmul.f32 %v3793_v15, %v4326_v14 }
 0x54f   : > { %3633 = vmatpush3.bf16.msra.mxu1 %v2398_v52  ;;  %3796 = vrcp.f32 %v2264_v26  ;;  %3634 = vmatprep.mubr.msk.bf16.mxu1 %vm3841_vm2, %v3840_v17 }
 0x550   : > { %3644 = vmatprep.subr.bf16.mxu1 %v3840_v17  ;;  %v2295_v45 = vpack.c.bf16 %v2287_v0, %v2287_v0  ;;  %3798 = vrcp.f32 %v2267_v33 }
 0x551   : > { %v3795_v10 = vpop.eup %3794 }
 0x552   : > { %v2286_v46 = vmul.f32 %v3795_v10, %v4330_v7  ;;  %v1492_v1 = vpop.permute.xlu1 %1491 }
 0x553   : > { %v1606_v19 = vrot.slane %v1492_v1, %v4081_v56 }
 0x554   : > { %v2294_v53 = vpack.c.bf16 %v2286_v46, %v2286_v46 }
 0x556   : > { %3629 = vmatmul.mubr.msk.bf16.vlgmr.msra.gmra.mrb[24].mxu0 %vm1821_vm3, %v2294_v53  ;;  %3635 = vmatmul.mubr.msk.bf16.vlgmr.msra.gmra.mrb[16].mxu1 %vm1821_vm3, %v2295_v45  ;;  %v1494_v4 = vpop.permute.xlu1 %1493 }
 0x557   : > { %3639 = vmatpush3.bf16.msra.mxu0 %v2444_v22  ;;  %3640 = vmatprep.mubr.msk.bf16.mxu0 %vm3841_vm2, %v3840_v17  ;;  %v1580_v51 = vrot.slane %v1494_v4, %v4081_v56 }
 0x558   : > { %3650 = vmatprep.subr.bf16.mxu0 %v3840_v17  ;;  %3646 = vmatprep.mubr.msk.bf16.mxu1 %vm3841_vm2, %v3840_v17 }
 0x559   : > { %v3797_v14 = vpop.eup %3796 }
 0x55a   : > { %v2288_v7 = vmul.f32 %v3797_v14, %v4338_v62  ;;  %v1496_v27 = vpop.permute.xlu1 %1495  ;;  %v3799_v52 = vpop.eup %3798 }
 0x55b   : > { %v1614_v41 = vrot.slane %v1496_v27, %v4081_v56 }
 0x55c   : > { %v2296_v34 = vpack.c.bf16 %v2288_v7, %v2288_v7  ;;  %v2289_v7 = vmul.f32 %v3799_v52, %v4334_v13 }
 0x55d   : > { %v1615_v3 = vcombine.low %v1606_v19, %v1614_v41  ;;  %v1616_v61 = vcombine.high %v1606_v19, %v1614_v41 }
 0x55e   : > { %3641 = vmatmul.mubr.msk.bf16.vlgmr.msra.gmra.mrb[28].mxu0 %vm1821_vm3, %v2296_v34 }
 0x55f   : > { %3652 = vmatprep.mubr.msk.bf16.mxu0 %vm3841_vm2, %v3840_v17  ;;  %v1623_v28 = vrot.slane %v1615_v3, %v4092_v2  ;;  %v1630_v62 = vrot.slane %v1616_v61, %v4092_v2 }
 0x561   : > { %v1631_v16 = vcombine.high %v1623_v28, %v3848_v9  ;;  %v1632_v18 = vcombine.high %v1630_v62, %v3848_v9  ;;  %v1670_v12 = vshrl.u32 %v1623_v28, 16  ;;  %v1686_v36 = vshrl.u32 %v1630_v62, 16 }
 0x563   : > { %v1678_v39 = vshrl.u32 %v1631_v16, 16  ;;  %v1694_v48 = vshrl.u32 %v1632_v18, 16 }
 0x57f   : > { %v2270_v37 = vpop.xlane.xlu0 %2269 }
 0x580   : > { %3800 = vrcp.f32 %v2270_v37 }
 0x583   : > { %v1490_v47 = vpop.permute.xlu0 %1489 }
 0x584   : > { %v1572_v5 = vrot.slane %v1490_v47, %v4081_v56 }
 0x586   : > { %v1581_v55 = vcombine.low %v1572_v5, %v1580_v51  ;;  %v1582_v8 = vcombine.high %v1572_v5, %v1580_v51 }
 0x588   : > { %v1589_v11 = vrot.slane %v1581_v55, %v4092_v2  ;;  %v1596_v35 = vrot.slane %v1582_v8, %v4092_v2 }
 0x58a   : > { %v1597_v30 = vcombine.high %v1589_v11, %v3848_v9  ;;  %v1598_v29 = vcombine.high %v1596_v35, %v3848_v9  ;;  %v1667_v31 = vpack.i.b16 %v1623_v28, %v1589_v11  ;;  %v1669_v49 = vshrl.u32 %v1589_v11, 16  ;;  %v3801_v22 = vpop.eup %3800 }
 0x58b   : > { %v1683_v42 = vpack.i.b16 %v1630_v62, %v1596_v35  ;;  %v1685_v25 = vshrl.u32 %v1596_v35, 16  ;;  %v2276_v26 = vpop.xlane.xlu1 %2275  ;;  %v2290_v33 = vmul.f32 %v3801_v22, %v4362_v32  ;;  %v2297_v62 = vpack.c.bf16 %v2289_v7, %v2289_v7 }
 0x58c   : > { %v1671_v21 = vpack.i.b16 %v1670_v12, %v1669_v49  ;;  %v1675_v50 = vpack.i.b16 %v1631_v16, %v1597_v30  ;;  %v1677_v40 = vshrl.u32 %v1597_v30, 16  ;;  %v1691_v54 = vpack.i.b16 %v1632_v18, %v1598_v29 }
 0x58d   : > { %v1687_v43 = vpack.i.b16 %v1686_v36, %v1685_v25  ;;  %v1693_v57 = vshrl.u32 %v1598_v29, 16  ;;  %v1747_v58 = vcombine.low %v1667_v31, %v1683_v42  ;;  %3802 = vrcp.f32 %v2276_v26 }
 0x58e   : > { %v1679_v23 = vpack.i.b16 %v1678_v39, %v1677_v40  ;;  %v1755_v60 = vcombine.low %v1675_v50, %v1691_v54  ;;  %v2298_v47 = vpack.c.bf16 %v2290_v33, %v2290_v33 }
 0x58f   : > { %v1695_v63 = vpack.i.b16 %v1694_v48, %v1693_v57  ;;  %v1772_v38 = vcombine.low %v1671_v21, %v1687_v43  ;;  %v1754_v6 = vrot.slane %v1747_v58, %v4081_v56 }
 0x590   : > { %v1762_v44 = vrot.slane %v1755_v60, %v4081_v56 }
 0x591   : > { %v1780_v24 = vcombine.low %v1679_v23, %v1695_v63  ;;  %v1779_v0 = vrot.slane %v1772_v38, %v4081_v56 }
 0x592   : > { %v1763_v15 = vcombine.low %v1754_v6, %v1762_v44 }
 0x593   : > { %v1787_v10 = vrot.slane %v1780_v24, %v4081_v56 }
 0x594   : > { %v1770_v46 = vrot.slane %v1763_v15, %v4092_v2 }
 0x595   : > { %v1788_v53 = vcombine.low %v1779_v0, %v1787_v10 }
 0x596   : > { %v1771_v45 = vcombine.high %v1770_v46, %v3848_v9  ;;  %v1812_v1 = vshrl.u32 %v1770_v46, 16 }
 0x597   : > { %v1795_v14 = vrot.slane %v1788_v53, %v4092_v2  ;;  %v3803_v32 = vpop.eup %3802 }
 0x598   : > { %v1818_v41 = vshrl.u32 %v1771_v45, 16  ;;  %v2292_v5 = vmul.f32 %v3803_v32, %v4370_v20 }
 0x599   : > { %v1811_v34 = vpack.i.b16 %v1795_v14, %v1770_v46  ;;  %v1813_v4 = vshrl.u32 %v1795_v14, 16  ;;  %v1796_v27 = vcombine.high %v1795_v14, %v3848_v9 }
 0x59a   : > { %v2300_v55 = vpack.c.bf16 %v2292_v5, %v2292_v5 }
 0x59b   : > { %v2490_v19 = vsel %vm2304_vm5, %v1811_v34, 0  ;;  %v1814_v3 = vpack.i.b16 %v1813_v4, %v1812_v1  ;;  %v1817_v61 = vpack.i.b16 %v1796_v27, %v1771_v45  ;;  %v1819_v37 = vshrl.u32 %v1796_v27, 16 }
 0x59c   : > { %3645 = vmatpush3.bf16.msra.mxu1 %v2490_v19 }
 0x59d   : > { %v2536_v28 = vsel %vm2304_vm5, %v1814_v3, 0  ;;  %3656 = vmatprep.subr.bf16.mxu1 %v3840_v17  ;;  %v1820_v13 = vpack.i.b16 %v1819_v37, %v1818_v41  ;;  %v2582_v9 = vsel %vm2304_vm5, %v1817_v61, 0 }
 0x59e   : > { %3651 = vmatpush3.bf16.msra.mxu0 %v2536_v28 }
 0x59f   : > { %3647 = vmatmul.mubr.msk.bf16.vlgmr.msra.gmra.mrb[20].mxu1 %vm1821_vm3, %v2297_v62  ;;  %3662 = vmatprep.subr.bf16.mxu0 %v3840_v17  ;;  %v2628_v51 = vsel %vm2304_vm5, %v1820_v13, 0 }
 0x5a0   : > { %3657 = vmatpush3.bf16.msra.mxu1 %v2582_v9  ;;  %3658 = vmatprep.mubr.msk.bf16.mxu1 %vm3841_vm2, %v3840_v17 }
 0x5a1   : > { %3653 = vmatmul.mubr.msk.bf16.vlgmr.msra.gmra.mrb[32].mxu0 %vm1821_vm3, %v2298_v47  ;;  %3668 = vmatprep.subr.bf16.mxu1 %v3840_v17 }
 0x5a2   : > { %3663 = vmatpush3.bf16.msra.mxu0 %v2628_v51  ;;  %3664 = vmatprep.mubr.msk.bf16.mxu0 %vm3841_vm2, %v3840_v17 }
 0x5a3   : > { %3676 = vmatprep.subr.bf16.mxu0 %v3840_v17 }
 0x5a9   : > { %3665 = vmatmul.mubr.msk.bf16.vlgmr.msra.gmra.mrb[36].mxu0 %vm1821_vm3, %v2300_v55 }
 0x5aa   : > { %3680 = vmatprep.mubr.msk.bf16.mxu0 %vm3841_vm2, %v3840_v17 }
 0x5b4   : > { %v2273_v8 = vpop.xlane.xlu0 %2272 }
 0x5b5   : > { %3804 = vrcp.f32 %v2273_v8 }
 0x5bf   : > { %v3805_v16 = vpop.eup %3804 }
 0x5c0   : > { %v2291_v18 = vmul.f32 %v3805_v16, %v4388_v59 }
 0x5c2   : > { %v2299_v11 = vpack.c.bf16 %v2291_v18, %v2291_v18 }
 0x5c4   : > { %3659 = vmatmul.mubr.msk.bf16.vlgmr.msra.gmra.mrb[24].mxu1 %vm1821_vm3, %v2299_v11 }
 0x5c5   : > { %3672 = vmatprep.mubr.msk.bf16.mxu1 %vm3841_vm2, %v3840_v17 }
 0x621   : > { %v2342_v20 = vpop.f32.mrb[12].mxu1 }
 0x622   : > { %v3624_v35 = vpop.f32.mrb[13].mxu1 }
 0x623   : > { %v2345_v12 = vpop.f32.mrb[14].mxu1 }
 0x624   : > { %v3625_v36 = vpop.f32.mrb[15].mxu1 }
 0x629   : > { %v2388_v30 = vpop.f32.mrb[24].mxu0  ;;  %v2434_v29 = vpop.f32.mrb[16].mxu1 }
 0x62a   : > { %v2670_v31 = vcombine.low %v2342_v20, %v2434_v29  ;;  %v2671_v49 = vcombine.high %v2342_v20, %v2434_v29  ;;  %v3630_v39 = vpop.f32.mrb[25].mxu0  ;;  %v3636_v48 = vpop.f32.mrb[17].mxu1 }
 0x62b   : > { %v2391_v42 = vpop.f32.mrb[26].mxu0  ;;  %v2437_v25 = vpop.f32.mrb[18].mxu1 }
 0x62c   : > { %v3631_v21 = vpop.f32.mrb[27].mxu0  ;;  %v3637_v59 = vpop.f32.mrb[19].mxu1  ;;  %v2678_v58 = vrot.slane %v2670_v31, %v4081_v56  ;;  %v2685_v23 = vrot.slane %v2671_v49, %v4081_v56 }
 0x631   : > { %v2480_v50 = vpop.f32.mrb[28].mxu0 }
 0x632   : > { %v2686_v40 = vcombine.low %v2388_v30, %v2480_v50  ;;  %v2687_v54 = vcombine.high %v2388_v30, %v2480_v50  ;;  %v3642_v43 = vpop.f32.mrb[29].mxu0 }
 0x633   : > { %v2483_v57 = vpop.f32.mrb[30].mxu0 }
 0x634   : > { %v2694_v60 = vrot.slane %v2686_v40, %v4081_v56  ;;  %v2701_v63 = vrot.slane %v2687_v54, %v4081_v56  ;;  %v3643_v38 = vpop.f32.mrb[31].mxu0 }
 0x636   : > { %v2702_v6 = vcombine.low %v2678_v58, %v2694_v60  ;;  %v2703_v44 = vcombine.high %v2678_v58, %v2694_v60  ;;  %v2718_v24 = vcombine.low %v2685_v23, %v2701_v63  ;;  %v2719_v15 = vcombine.high %v2685_v23, %v2701_v63 }
 0x638   : > { %v2710_v52 = vrot.slane %v2702_v6, %v4092_v2  ;;  %v2717_v26 = vrot.slane %v2703_v44, %v4092_v2  ;;  %v2726_v0 = vrot.slane %v2718_v24, %v4092_v2  ;;  %v2733_v10 = vrot.slane %v2719_v15, %v4092_v2  ;;  %v3758_v15 = vld [vmem:[%s4632_s23] sm:$0xff]  }
 0x639   : > { %3669 = vmatpush3.bf16.msra.mxu1 %v3758_v15 }
 0x63a   : > { %v2806_v46 = vcombine.low %v2710_v52, %v2717_v26  ;;  %v3483_v53 = vcombine.high %v2710_v52, %v2717_v26  ;;  %v2822_v45 = vcombine.low %v2726_v0, %v2733_v10  ;;  %v3484_v22 = vcombine.high %v2726_v0, %v2733_v10  ;;  %3670 = vmatprep.subr.bf16.mxu1 %v3840_v17 }
 0x63c   : > { %v2813_v14 = vrot.slane %v2806_v46, %v4081_v56  ;;  %v2821_v7 = vrot.slane %v3483_v53, %v4081_v56  ;;  %v2829_v34 = vrot.slane %v2822_v45, %v4081_v56  ;;  %v2837_v1 = vrot.slane %v3484_v22, %v4081_v56 }
 0x63e   : > { %v2839_v4 = vcombine.high %v2813_v14, %v2821_v7  ;;  %v2855_v27 = vcombine.high %v2829_v34, %v2837_v1  ;;  %v2838_v33 = vcombine.low %v2813_v14, %v2821_v7  ;;  %v2854_v41 = vcombine.low %v2829_v34, %v2837_v1 }
 0x640   : > { %v4469_v19 = vrot.slane %v2839_v4, %v4092_v2  ;;  %v4472_v3 = vrot.slane %v2855_v27, %v4092_v2  ;;  %v4475_v61 = vrot.slane %v2838_v33, %v4092_v2  ;;  %v4478_v37 = vrot.slane %v2854_v41, %v4092_v2  ;;  %v3759_v4 = vld [vmem:[%s4632_s23 + $0x8] sm:$0xff]  }
 0x641   : > { %3671 = vmatpush3.bf16.msra.mxu1 %v3759_v4 }
 0x642   : > { %v2872_v28 = vcombine.low %v4469_v19, %v4472_v3  ;;  %v2870_v62 = vcombine.low %v4475_v61, %v4478_v37  ;;  %v2871_v13 = vcombine.high %v4475_v61, %v4478_v37  ;;  %v2873_v9 = vcombine.high %v4469_v19, %v4472_v3  ;;  %3684 = vmatprep.subr.bf16.mxu1 %v3840_v17  ;;  %v3487_v61 = vld [vmem:[%s4633_s27] ss:$0 sm:$0xff] }
 0x672   : > { %v2526_v47 = vpop.f32.mrb[20].mxu1 }
 0x673   : > { %v3648_v32 = vpop.f32.mrb[21].mxu1 }
 0x674   : > { %v2529_v51 = vpop.f32.mrb[22].mxu1  ;;  %v2572_v5 = vpop.f32.mrb[32].mxu0 }
 0x675   : > { %v3649_v55 = vpop.f32.mrb[23].mxu1  ;;  %v3654_v8 = vpop.f32.mrb[33].mxu0 }
 0x676   : > { %v2575_v16 = vpop.f32.mrb[34].mxu0 }
 0x677   : > { %v3655_v18 = vpop.f32.mrb[35].mxu0 }
 0x67c   : > { %v2664_v11 = vpop.f32.mrb[36].mxu0 }
 0x67d   : > { %v2754_v20 = vcombine.low %v2572_v5, %v2664_v11  ;;  %v2755_v35 = vcombine.high %v2572_v5, %v2664_v11  ;;  %v3666_v12 = vpop.f32.mrb[37].mxu0 }
 0x67e   : > { %v2667_v36 = vpop.f32.mrb[38].mxu0 }
 0x67f   : > { %v3667_v30 = vpop.f32.mrb[39].mxu0  ;;  %v2762_v42 = vrot.slane %v2754_v20, %v4081_v56  ;;  %v2769_v25 = vrot.slane %v2755_v35, %v4081_v56 }
 0x697   : > { %v2618_v29 = vpop.f32.mrb[24].mxu1 }
 0x698   : > { %v2738_v31 = vcombine.low %v2526_v47, %v2618_v29  ;;  %v2739_v49 = vcombine.high %v2526_v47, %v2618_v29  ;;  %v3660_v39 = vpop.f32.mrb[25].mxu1 }
 0x699   : > { %v2621_v48 = vpop.f32.mrb[26].mxu1 }
 0x69a   : > { %v2746_v21 = vrot.slane %v2738_v31, %v4081_v56  ;;  %v2753_v59 = vrot.slane %v2739_v49, %v4081_v56  ;;  %v3661_v50 = vpop.f32.mrb[27].mxu1  ;;  %v3814_v31 = vld [vmem:[%s4610_s13] sm:$0xff] }
 0x69c   : > { %v2770_v40 = vcombine.low %v2746_v21, %v2762_v42  ;;  %v2771_v54 = vcombine.high %v2746_v21, %v2762_v42  ;;  %v2786_v43 = vcombine.low %v2753_v59, %v2769_v25  ;;  %v2787_v57 = vcombine.high %v2753_v59, %v2769_v25  ;;  %v3815_v42 = vld [vmem:[%s4610_s13 + $0x8] sm:$0xff] }
 0x69e   : > { %v2778_v58 = vrot.slane %v2770_v40, %v4092_v2  ;;  %v2785_v23 = vrot.slane %v2771_v54, %v4092_v2  ;;  %v2794_v60 = vrot.slane %v2786_v43, %v4092_v2  ;;  %v2801_v63 = vrot.slane %v2787_v57, %v4092_v2 }
 0x6a0   : > { %v2874_v38 = vcombine.low %v2778_v58, %v2785_v23  ;;  %v3485_v6 = vcombine.high %v2778_v58, %v2785_v23  ;;  %v2890_v44 = vcombine.low %v2794_v60, %v2801_v63  ;;  %v3486_v24 = vcombine.high %v2794_v60, %v2801_v63 }
 0x6a2   : > { %v2881_v52 = vrot.slane %v2874_v38, %v4081_v56  ;;  %v2889_v26 = vrot.slane %v3485_v6, %v4081_v56  ;;  %v2897_v0 = vrot.slane %v2890_v44, %v4081_v56  ;;  %v2905_v10 = vrot.slane %v3486_v24, %v4081_v56  ;;  %v3760_v6 = vld [vmem:[%s3981_s3] sm:$0xff]   ;;  %v3761_v44 = vld [vmem:[%s3981_s3 + $0x8] sm:$0xff]  }
 0x6a3   : > { %3677 = vmatpush3.bf16.msra.mxu0 %v3760_v6 }
 0x6a4   : > { %v2907_v46 = vcombine.high %v2881_v52, %v2889_v26  ;;  %v2923_v53 = vcombine.high %v2897_v0, %v2905_v10  ;;  %v2906_v45 = vcombine.low %v2881_v52, %v2889_v26  ;;  %v2922_v22 = vcombine.low %v2897_v0, %v2905_v10  ;;  %3678 = vmatprep.subr.bf16.mxu0 %v3840_v17 }
 0x6a6   : > { %v2921_v14 = vrot.slane %v2907_v46, %v4092_v2  ;;  %v2937_v7 = vrot.slane %v2923_v53, %v4092_v2  ;;  %v2914_v34 = vrot.slane %v2906_v45, %v4092_v2  ;;  %v2930_v1 = vrot.slane %v2922_v22, %v4092_v2  ;;  %v3491_v45 = vld [vmem:[%s622_s2] ss:$0 sm:$0xff] }
 0x6a7   : > { %3679 = vmatpush3.bf16.msra.mxu0 %v3761_v44 }
 0x6a8   : > { %v2940_v27 = vcombine.low %v2921_v14, %v2937_v7  ;;  %v2939_v33 = vcombine.high %v2914_v34, %v2930_v1  ;;  %v2938_v41 = vcombine.low %v2914_v34, %v2930_v1  ;;  %v2941_v56 = vcombine.high %v2921_v14, %v2937_v7  ;;  %v3492_v34 = vld [vmem:[%s625_s22] ss:$0 sm:$0xff] }
 0x6aa   : > { %v3746_v19 = vpack.i.bf16 %v2940_v27, %v2872_v28  ;;  %v3741_v3 = vpack.i.bf16 %v2939_v33, %v2871_v13  ;;  %v3751_v47 = vpack.i.bf16 %v2941_v56, %v2873_v9  ;;  %v3763_v56 = vld [vmem:[%s3991_s16 + $0x8] sm:$0xff]  }
 0x6ac   : > { %3747 = vrot.lane.b32.xlu1 %v3746_v19, %s3850_s19  ;;  %3742 = vrot.lane.b32.xlu0 %v3741_v3, %s3851_s24  ;;  %v3764_v19 = vld [vmem:[%s3991_s16 + $0x10] sm:$0xff]   ;;  %v3765_v3 = vld [vmem:[%s3991_s16 + $0x18] sm:$0xff]  }
 0x6b0   : > { %3752 = vrot.lane.b32.xlu0 %v3751_v47, %s3852_s28  ;;  %v3766_v47 = vld [vmem:[%s3991_s16 + $0x20] sm:$0xff]  }
 0x71e   : > { %v3748_v32 = vpop.permute.xlu1 %3747  ;;  %v3743_v51 = vpop.permute.xlu0 %3742 }
 0x71f   : > { %v3745_v2 = vunpack.i.h.bf16 %v3743_v51  ;;  %v3744_v5 = vunpack.i.l.bf16 %v3743_v51  ;;  %v3750_v55 = vunpack.i.h.bf16 %v3748_v32  ;;  %v3749_v8 = vunpack.i.l.bf16 %v3748_v32  ;;  %v3767_v32 = vld [vmem:[%s3991_s16 + $0x28] sm:$0xff]   ;;  %v3768_v51 = vld [vmem:[%s3991_s16 + $0x30] sm:$0xff]  }
 0x721   : > { %v2966_v28 = vsel %vm1821_vm3, %v2870_v62, %v3744_v5  ;;  %v2967_v13 = vsel %vm1821_vm3, %v2938_v41, %v3745_v2  ;;  %v3762_v41 = vld [vmem:[%s3991_s16] sm:$0xff]   ;;  %v3769_v2 = vld [vmem:[%s3991_s16 + $0x38] sm:$0xff]  }
 0x722   : > { %v3753_v9 = vpop.permute.xlu0 %3752  ;;  %v2969_v11 = vsel %vm2968_vm6, %v2966_v28, %v3749_v8  ;;  %v2970_v20 = vsel %vm2968_vm6, %v2967_v13, %v3750_v55  ;;  %v3493_v5 = vld [vmem:[%s633_s5] ss:$0 sm:$0xff] }
 0x723   : > { %v3755_v16 = vunpack.i.h.bf16 %v3753_v9  ;;  %v3754_v18 = vunpack.i.l.bf16 %v3753_v9 }
 0x725   : > { %v2972_v35 = vsel %vm2971_vm7, %v2969_v11, %v3754_v18  ;;  %v2973_v12 = vsel %vm2971_vm7, %v2970_v20, %v3755_v16 }
 0x726   : > { %v2974_v36 = vpack.c.bf16 %v2973_v12, %v2972_v35 }
 0x728   : > { %3673 = vmatmul.mubr.msk.bf16.vlgmr.msra.gmra.mrb[28].mxu1 %vm696_vm1, %v2974_v36 }
 0x729   : > { %3700 = vmatprep.mubr.msk.bf16.mxu1 %vm3841_vm2, %v3840_v17  ;;  %3685 = vmatpush3.bf16.msra.mxu1 %v3762_v41 }
 0x72a   : > { %3686 = vmatprep.subr.bf16.mxu1 %v3840_v17 }
 0x72d   : > { %3687 = vmatpush3.bf16.msra.mxu1 %v3763_v56 }
 0x72e   : > { %3688 = vmatprep.subr.bf16.mxu1 %v3840_v17 }
 0x731   : > { %3689 = vmatpush3.bf16.msra.mxu1 %v3764_v19 }
 0x732   : > { %3690 = vmatprep.subr.bf16.mxu1 %v3840_v17 }
 0x735   : > { %3691 = vmatpush3.bf16.msra.mxu1 %v3765_v3 }
 0x736   : > { %3692 = vmatprep.subr.bf16.mxu1 %v3840_v17 }
 0x739   : > { %3693 = vmatpush3.bf16.msra.mxu1 %v3766_v47 }
 0x73a   : > { %3694 = vmatprep.subr.bf16.mxu1 %v3840_v17 }
 0x73d   : > { %3695 = vmatpush3.bf16.msra.mxu1 %v3767_v32 }
 0x73e   : > { %3696 = vmatprep.subr.bf16.mxu1 %v3840_v17 }
 0x741   : > { %3697 = vmatpush3.bf16.msra.mxu1 %v3768_v51 }
 0x742   : > { %3698 = vmatprep.subr.bf16.mxu1 %v3840_v17 }
 0x745   : > { %3699 = vmatpush3.bf16.msra.mxu1 %v3769_v2 }
 0x7fb   : > { %v3030_v37 = vpop.f32.mrb[28].mxu1 }
 0x7fc   : > { %v3031_v62 = vadd.f32 %v3487_v61, %v3030_v37  ;;  %v3674_v30 = vpop.f32.mrb[29].mxu1 }
 0x7fd   : > { %v3033_v29 = vpop.f32.mrb[30].mxu1 }
 0x7fe   : > { %v4524_v49 = vadd.f32 %v3814_v31, %v3031_v62  ;;  %v3034_v39 = vadd.f32 %v3487_v61, %v3033_v29  ;;  %v3675_v48 = vpop.f32.mrb[31].mxu1 }
 0x800   : > { %v4529_v25 = vadd.f32 %v3815_v42, %v3034_v39  ;;  %v3039_v21 = vsel %vm696_vm1, %v4524_v49, 0.0 }
 0x801   : > { %3040 = vadd.xlane.f32.xlu1 %v3039_v21 }
 0x802   : > { %v3042_v59 = vsel %vm696_vm1, %v4529_v25, 0.0 }
 0x803   : > { %3043 = vadd.xlane.f32.xlu0 %v3042_v59 }
 0x88e   : > { %v3041_v50 = vpop.xlane.xlu1 %3040 }
 0x88f   : > { %v3045_v40 = vmul.f32 0.03125, %v3041_v50 }
 0x890   : > { %v3044_v54 = vpop.xlane.xlu0 %3043 }
 0x891   : > { %v3047_v43 = vsub.f32 %v4524_v49, %v3045_v40  ;;  %v3046_v57 = vmul.f32 0.03125, %v3044_v54  ;;  %v3497_v40 = vld [vmem:[%s641_s20] ss:$0 sm:$0xff] }
 0x893   : > { %v3048_v58 = vsub.f32 %v4529_v25, %v3046_v57  ;;  %v3049_v23 = vmul.f32 %v3047_v43, %v3047_v43 }
 0x895   : > { %v3051_v60 = vsel %vm696_vm1, %v3049_v23, 0.0  ;;  %v3050_v63 = vmul.f32 %v3048_v58, %v3048_v58 }
 0x896   : > { %3052 = vadd.xlane.f32.xlu0 %v3051_v60 }
 0x897   : > { %v3054_v38 = vsel %vm696_vm1, %v3050_v63, 0.0 }
 0x89a   : > { %3055 = vadd.xlane.f32.xlu0 %v3054_v38 }
 0x923   : > { %v3053_v24 = vpop.xlane.xlu0 %3052 }
 0x924   : > { %v3057_v15 = vmul.f32 0.03125, %v3053_v24 }
 0x926   : > { %v3059_v52 = vadd.f32 1e-05, %v3057_v15 }
 0x927   : > { %v3056_v26 = vpop.xlane.xlu0 %3055 }
 0x928   : > { %3806 = vrsqrt.f32 %v3059_v52  ;;  %v3058_v0 = vmul.f32 0.03125, %v3056_v26 }
 0x92a   : > { %v3060_v10 = vadd.f32 1e-05, %v3058_v0 }
 0x92c   : > { %3808 = vrsqrt.f32 %v3060_v10 }
 0x932   : > { %v3807_v46 = vpop.eup %3806 }
 0x933   : > { %v3063_v53 = vmul.f32 %v3807_v46, %v3047_v43 }
 0x935   : > { %v3071_v14 = vmul.f32 %v3491_v45, %v3063_v53 }
 0x936   : > { %v3809_v22 = vpop.eup %3808 }
 0x937   : > { %v3064_v7 = vmul.f32 %v3809_v22, %v3048_v58  ;;  %v3079_v4 = vadd.f32 %v3492_v34, %v3071_v14 }
 0x939   : > { %v3072_v1 = vmul.f32 %v3491_v45, %v3064_v7 }
 0x93b   : > { %v3080_v27 = vadd.f32 %v3492_v34, %v3072_v1 }
 0x93d   : > { %v3081_v33 = vpack.c.bf16 %v3080_v27, %v3079_v4 }
 0x93f   : > { %3681 = vmatmul.mubr.msk.bf16.vlgmr.msra.gmra.mrb[40].mxu0 %vm696_vm1, %v3081_v33 }
 0xa12   : > { %v3137_v55 = vpop.f32.mrb[40].mxu0 }
 0xa13   : > { %v3138_v8 = vadd.f32 %v3493_v5, %v3137_v55  ;;  %v3682_v28 = vpop.f32.mrb[41].mxu0 }
 0xa14   : > { %v3140_v13 = vpop.f32.mrb[42].mxu0 }
 0xa15   : > { %v3146_v9 = vmul.f32 0.044715, %v3138_v8  ;;  %v3141_v16 = vadd.f32 %v3493_v5, %v3140_v13  ;;  %v3683_v18 = vpop.f32.mrb[43].mxu0  ;;  %v3144_v39 = vmul.f32 0.5, %v3138_v8 }
 0xa17   : > { %v3148_v11 = vmul.f32 %v3146_v9, %v3138_v8  ;;  %v3147_v20 = vmul.f32 0.044715, %v3141_v16  ;;  %v3145_v48 = vmul.f32 0.5, %v3141_v16 }
 0xa19   : > { %v3150_v35 = vmul.f32 %v3148_v11, %v3138_v8  ;;  %v3149_v12 = vmul.f32 %v3147_v20, %v3141_v16 }
 0xa1b   : > { %v3152_v36 = vadd.f32 %v3150_v35, %v3138_v8  ;;  %v3151_v61 = vmul.f32 %v3149_v12, %v3141_v16 }
 0xa1d   : > { %v3154_v17 = vmul.f32 0.7978846, %v3152_v36  ;;  %v3153_v37 = vadd.f32 %v3151_v61, %v3141_v16 }
 0xa1f   : > { %3810 = vtanh.f32 %v3154_v17  ;;  %v3155_v62 = vmul.f32 0.7978846, %v3153_v37 }
 0xa21   : > { %3812 = vtanh.f32 %v3155_v62 }
 0xa29   : > { %v3811_v30 = vpop.eup %3810 }
 0xa2a   : > { %v3158_v29 = vadd.f32 1.0, %v3811_v30 }
 0xa2b   : > { %v3813_v31 = vpop.eup %3812 }
 0xa2c   : > { %v3159_v42 = vadd.f32 1.0, %v3813_v31  ;;  %v3160_v21 = vmul.f32 %v3158_v29, %v3144_v39 }
 0xa2e   : > { %v3161_v59 = vmul.f32 %v3159_v42, %v3145_v48 }
 0xa30   : > { %v3162_v50 = vpack.c.bf16 %v3161_v59, %v3160_v21 }
 0xa32   : > { %3701 = vmatmul.mubr.bf16.vlgmr.msra.gmra.mrb[32].mxu1 %v3162_v50 }
 0xb05   : > { %v3251_v54 = vpop.f32.mrb[32].mxu1 }
 0xb06   : > { %v3252_v43 = vadd.f32 %v3497_v40, %v3251_v54  ;;  %v3702_v57 = vpop.f32.mrb[33].mxu1 }
 0xb07   : > { %v3254_v58 = vpop.f32.mrb[34].mxu1 }
 0xb08   : > { %v3258_v23 = vadd.f32 %v3252_v43, %v4524_v49  ;;  %v3255_v60 = vadd.f32 %v3497_v40, %v3254_v58  ;;  %v3703_v63 = vpop.f32.mrb[35].mxu1 }
 0xb0a   : > { %3260 = vst.msk [vmem:[%s4610_s13] sm:$0xff] %vm696_vm1, %v3258_v23  ;;  %v3259_v38 = vadd.f32 %v3255_v60, %v4529_v25 }
 0xb0c   : > { %3261 = vst.msk [vmem:[%s4610_s13 + $0x8] sm:$0xff] %vm696_vm1, %v3259_v38 }
 0xb0d PF: > { %s4634_s29 = sld [smem:[#allocation3_spill]]  ;;  %s4635_s25 = sld [smem:[#allocation2_spill]] }
 0xb0e   : > { %s4636_s26 = sld [smem:[#allocation4_spill]] }
 0xb13   : > { %s23_s27 = sadd.s32 1, %s4634_s29  }
 0xb14   : > { %p20_p6 = scmp.ge.s32.totalorder %s23_s27, 4  }
 0xb16   :  { %22 = sbr.rel (!%p20_p6) target bundleno = 4 (0x4), region = 142 }

</bundles_post_ra>
